<compile_context>
chip_gen: v5e
topology: v5e:2x2
jax: 0.10.0
libtpu: 0.0.40
codegen_flags: <defaults>
</compile_context>

<pallas_src>
import functools

import jax
import jax.numpy as jnp
from jax import lax
from jax.experimental import pallas as pl
from jax.experimental.pallas import tpu as pltpu


# ----------------------------------------------------------------------------- #
# Fused kernel: offset conv (conv1) + deformable 3x3 conv (conv2)
# One grid step = (one image, one 128-wide slab of output pixels).
# ----------------------------------------------------------------------------- #
def _dconv_kernel(xcol_ref, xrows_ref, base_ref, w1_ref, w2_ref, o_ref, s_ref,
                  *, H, W, Cin, Cout, K):
    taps = K * K
    pad = K // 2
    TN = o_ref.shape[-1]                      # lane-slab of output pixels (128 or HW)

    xcol = xcol_ref[...]                      # (taps*Cin, TN)  im2col columns for conv1
    xr = xrows_ref[...]                       # (Cin*H, W)      full image, row-major rows
    base = base_ref[...]                      # (2, TN)         output (row, col) coords
    oy = base[0:1, :]
    ox = base[1:2, :]

    # conv1: offset prediction, one lane-dense matmul.
    # Offset channel layout matches torchvision deform_conv2d: 2k = dy, 2k+1 = dx.
    off = jnp.dot(w1_ref[...], xcol, preferred_element_type=jnp.float32)   # (2*taps, TN)

    # In-range input-coordinate iotas (hoisted out of the tap loop).  OOB sample
    # coordinates simply never match -> zero contribution, no clipping/aliasing.
    col_iota = lax.broadcasted_iota(jnp.int32, (W, TN), 0)
    row_iota = lax.broadcasted_iota(jnp.int32, (H, TN), 0)

    for k in range(taps):                     # 9 taps; per-tap live set is small now
        dy = float(k // K - pad)
        dx = float(k % K - pad)
        sy = oy + dy + off[2 * k:2 * k + 1, :]          # fractional sample row (1, TN)
        sx = ox + dx + off[2 * k + 1:2 * k + 2, :]      # fractional sample col (1, TN)
        y0 = jnp.floor(sy)
        x0 = jnp.floor(sx)
        fy = sy - y0
        fx = sx - x0
        y0i = y0.astype(jnp.int32)
        x0i = x0.astype(jnp.int32)

        # Separable bilinear weights (single fused expression per axis, no RMW passes).
        ax = (jnp.where(col_iota == x0i, 1.0 - fx, 0.0) +
              jnp.where(col_iota == x0i + 1, fx, 0.0))                     # (W, TN)
        wy = (jnp.where(row_iota == y0i, 1.0 - fy, 0.0) +
              jnp.where(row_iota == y0i + 1, fy, 0.0))                     # (H, TN)

        # x-gather on the MXU, then H-term weighted y-reduction on the VPU/XLU.
        g = jnp.dot(xr, ax, preferred_element_type=jnp.float32)           # (Cin*H, TN)
        samp = (g.reshape(Cin, H, TN) * wy[None, :, :]).sum(axis=1)       # (Cin, TN)
        s_ref[k * Cin:(k + 1) * Cin, :] = samp                            # stack samples

    # One channel-mixing matmul over all taps: (Cout, 9*Cin) @ (9*Cin, TN).
    o_ref[...] = jnp.dot(w2_ref[...], s_ref[...], preferred_element_type=jnp.float32)


def dconv_pallas(x_nchw, w1, w2):
    """x: (B, Cin, H, W); w1: (2*K*K, Cin, K, K); w2: (Cout, Cin, K, K)."""
    x = x_nchw.astype(jnp.float32)
    B, Cin, H, W = x.shape
    K = 3
    pad = K // 2
    taps = K * K
    Coff = 2 * taps
    Cout = w2.shape[0]
    HW = H * W
    TN = 128 if HW % 128 == 0 else HW        # lane-dense output-pixel slab

    # --- tiny host-side glue: im2col for conv1 + weight / base-coordinate reshapes ---
    x_pad = jnp.pad(x, ((0, 0), (0, 0), (pad, pad), (pad, pad)))
    cols = [x_pad[:, :, dy:dy + H, dx:dx + W].reshape(B, Cin, HW)
            for dy in range(K) for dx in range(K)]
    xcol = jnp.concatenate(cols, axis=1)                     # (B, taps*Cin, HW)
    xrows = x.reshape(B, Cin * H, W)                         # (B, Cin*H, W) for x-gather

    w1m = jnp.transpose(w1, (0, 2, 3, 1)).reshape(Coff, taps * Cin).astype(jnp.float32)
    w2m = jnp.transpose(w2, (0, 2, 3, 1)).reshape(Cout, taps * Cin).astype(jnp.float32)

    gy, gx = jnp.meshgrid(jnp.arange(H, dtype=jnp.float32),
                          jnp.arange(W, dtype=jnp.float32), indexing="ij")
    base = jnp.stack([gy.reshape(HW), gx.reshape(HW)], axis=0)   # (2, HW)

    kernel = functools.partial(_dconv_kernel, H=H, W=W, Cin=Cin, Cout=Cout, K=K)

    out = pl.pallas_call(
        kernel,
        out_shape=jax.ShapeDtypeStruct((B, Cout, HW), jnp.float32),
        grid=(B, HW // TN),
        in_specs=[
            pl.BlockSpec((None, taps * Cin, TN), lambda b, j: (b, 0, j)),
            pl.BlockSpec((None, Cin * H, W), lambda b, j: (b, 0, 0)),
            pl.BlockSpec((2, TN), lambda b, j: (0, j)),
            pl.BlockSpec((Coff, taps * Cin), lambda b, j: (0, 0)),
            pl.BlockSpec((Cout, taps * Cin), lambda b, j: (0, 0)),
        ],
        out_specs=pl.BlockSpec((None, Cout, TN), lambda b, j: (b, 0, j)),
        scratch_shapes=[pltpu.VMEM((taps * Cin, TN), jnp.float32)],
        compiler_params=pltpu.CompilerParams(
            dimension_semantics=("parallel", "parallel")),
    )(xcol, xrows, base, w1m, w2m)

    return out.reshape(B, Cout, H, W)


# ----------------------------------------------------------------------------- #
# Plain-JAX reference (mirrors PyTorch: Conv2d + torchvision.ops.deform_conv2d)
# ----------------------------------------------------------------------------- #
def dconv_reference(x_nchw, w1, w2):
    x = x_nchw.astype(jnp.float32)
    B, Cin, H, W = x.shape
    Cout = w2.shape[0]
    K = 3

    offsets = lax.conv_general_dilated(
        x, w1.astype(jnp.float32), (1, 1), ((1, 1), (1, 1)),
        dimension_numbers=("NCHW", "OIHW", "NCHW"))            # (B, 18, H, W)

    x_flat = x.reshape(B, Cin, H * W)
    gy, gx = jnp.meshgrid(jnp.arange(H, dtype=jnp.float32),
                          jnp.arange(W, dtype=jnp.float32), indexing="ij")

    out = jnp.zeros((B, Cout, H, W), jnp.float32)
    for k in range(K * K):
        dy, dx = k // K - 1, k % K - 1
        sy = gy[None] + float(dy) + offsets[:, 2 * k]          # (B, H, W)
        sx = gx[None] + float(dx) + offsets[:, 2 * k + 1]
        y0 = jnp.floor(sy)
        x0 = jnp.floor(sx)
        fy = sy - y0
        fx = sx - x0

        samp = jnp.zeros((B, Cin, H, W), jnp.float32)
        for cy, wy in ((0.0, 1.0 - fy), (1.0, fy)):
            for cx, wx in ((0.0, 1.0 - fx), (1.0, fx)):
                yc = y0 + cy
                xc = x0 + cx
                valid = (yc >= 0) & (yc <= H - 1) & (xc >= 0) & (xc <= W - 1)
                wgt = jnp.where(valid, wy * wx, 0.0)           # (B, H, W)
                yci = jnp.clip(yc, 0, H - 1).astype(jnp.int32)
                xci = jnp.clip(xc, 0, W - 1).astype(jnp.int32)
                fidx = (yci * W + xci).reshape(B, 1, H * W)
                g = jnp.take_along_axis(
                    x_flat, jnp.broadcast_to(fidx, (B, Cin, H * W)), axis=2)
                samp = samp + wgt[:, None] * g.reshape(B, Cin, H, W)

        out = out + jnp.einsum("oc,bchw->bohw", w2[:, :, k // K, k % K], samp)
    return out


# ----------------------------------------------------------------------------- #
if __name__ == "__main__":
    B, inplanes, planes, H, W = 2, 4, 8, 16, 16      # DConv(inplanes=4, planes=8)
    K = 3
    key = jax.random.PRNGKey(0)
    k1, k2, k3 = jax.random.split(key, 3)

    # conv1: Cin -> 2*K*K offset channels, bias=False
    w1 = 0.2 * jax.random.normal(k1, (2 * K * K, inplanes, K, K), jnp.float32)
    # conv2 (deformable): Cin -> planes, bias=False
    w2 = 0.2 * jax.random.normal(k2, (planes, inplanes, K, K), jnp.float32)
    x = jax.random.normal(k3, (B, inplanes, H, W), jnp.float32)

    out_pallas = dconv_pallas(x, w1, w2)
    jax.block_until_ready(out_pallas)

    out_ref = dconv_reference(x, w1, w2)
    jax.block_until_ready(out_ref)

    err = float(jnp.max(jnp.abs(out_pallas - out_ref)))
    scale = float(jnp.max(jnp.abs(out_ref))) + 1e-8
    assert out_pallas.shape == (B, planes, H, W)
    assert err <= 1e-3 * scale + 1e-3, f"mismatch: max abs err {err}"
    print("KERNEL_OK")
</pallas_src>

<mosaic_0001>
module attributes {stable_mosaic.version = 11 : i64} {
  func.func @_dconv_kernel(%arg0: i32, %arg1: i32, %arg2: memref<1x36x128xf32, #tpu.memory_space<vmem>>, %arg3: memref<1x64x16xf32, #tpu.memory_space<vmem>>, %arg4: memref<2x128xf32, #tpu.memory_space<vmem>>, %arg5: memref<18x36xf32, #tpu.memory_space<vmem>>, %arg6: memref<8x36xf32, #tpu.memory_space<vmem>>, %arg7: memref<1x8x128xf32, #tpu.memory_space<vmem>>, %arg8: memref<36x128xf32, #tpu.memory_space<vmem>>) attributes {dimension_semantics = [#tpu.dimension_semantics<parallel>, #tpu.dimension_semantics<parallel>], iteration_bounds = array<i64: 2, 2>, scalar_prefetch = 0 : i64, scratch_operands = 1 : i64, tpu.core_type = #tpu.core_type<tc>, window_params = [{transform_indices = @transform_0, window_bounds = array<i64: 1, 36, 128>}, {transform_indices = @transform_1, window_bounds = array<i64: 1, 64, 16>}, {transform_indices = @transform_2, window_bounds = array<i64: 2, 128>}, {pipeline_mode = #tpu.pipeline_mode<synchronous>, transform_indices = @transform_3, window_bounds = array<i64: 18, 36>}, {pipeline_mode = #tpu.pipeline_mode<synchronous>, transform_indices = @transform_4, window_bounds = array<i64: 8, 36>}, {transform_indices = @transform_5, window_bounds = array<i64: 1, 8, 128>}]} {
    %c0 = arith.constant 0 : index
    %c0_0 = arith.constant 0 : index
    %c0_1 = arith.constant 0 : index
    %0 = vector.load %arg2[%c0, %c0_0, %c0_1] : memref<1x36x128xf32, #tpu.memory_space<vmem>>, vector<1x36x128xf32>
    %1 = vector.shape_cast %0 : vector<1x36x128xf32> to vector<36x128xf32>
    %c0_2 = arith.constant 0 : index
    %c0_3 = arith.constant 0 : index
    %c0_4 = arith.constant 0 : index
    %2 = vector.load %arg3[%c0_2, %c0_3, %c0_4] : memref<1x64x16xf32, #tpu.memory_space<vmem>>, vector<1x64x16xf32>
    %3 = vector.shape_cast %2 : vector<1x64x16xf32> to vector<64x16xf32>
    %c0_5 = arith.constant 0 : index
    %c0_6 = arith.constant 0 : index
    %4 = vector.load %arg4[%c0_5, %c0_6] : memref<2x128xf32, #tpu.memory_space<vmem>>, vector<2x128xf32>
    %5 = vector.extract_strided_slice %4 {offsets = [0, 0], sizes = [1, 128], strides = [1, 1]} : vector<2x128xf32> to vector<1x128xf32>
    %6 = vector.extract_strided_slice %4 {offsets = [1, 0], sizes = [1, 128], strides = [1, 1]} : vector<2x128xf32> to vector<1x128xf32>
    %c0_7 = arith.constant 0 : index
    %c0_8 = arith.constant 0 : index
    %7 = vector.load %arg5[%c0_7, %c0_8] : memref<18x36xf32, #tpu.memory_space<vmem>>, vector<18x36xf32>
    %cst = arith.constant dense<0.000000e+00> : vector<18x128xf32>
    %8 = tpu.matmul %7, %1, %cst {dimension_numbers = #tpu.dot_dimension_numbers<[1], [0], [0], [1], [0, 0, 1, 1], [], []>} : vector<18x36xf32>, vector<36x128xf32>, vector<18x128xf32> -> vector<18x128xf32>
    %9 = tpu.iota {dimensions = array<i32: 0>} : vector<16x128xi32>
    %10 = tpu.iota {dimensions = array<i32: 0>} : vector<16x128xi32>
    %cst_9 = arith.constant -1.000000e+00 : f32
    %11 = vector.broadcast %cst_9 : f32 to vector<1x128xf32>
    %12 = arith.addf %5, %11 : vector<1x128xf32>
    %13 = vector.extract_strided_slice %8 {offsets = [0, 0], sizes = [1, 128], strides = [1, 1]} : vector<18x128xf32> to vector<1x128xf32>
    %14 = arith.addf %12, %13 : vector<1x128xf32>
    %cst_10 = arith.constant -1.000000e+00 : f32
    %15 = vector.broadcast %cst_10 : f32 to vector<1x128xf32>
    %16 = arith.addf %6, %15 : vector<1x128xf32>
    %17 = vector.extract_strided_slice %8 {offsets = [1, 0], sizes = [1, 128], strides = [1, 1]} : vector<18x128xf32> to vector<1x128xf32>
    %18 = arith.addf %16, %17 : vector<1x128xf32>
    %19 = math.floor %14 : vector<1x128xf32>
    %20 = math.floor %18 : vector<1x128xf32>
    %21 = arith.subf %14, %19 : vector<1x128xf32>
    %22 = arith.subf %18, %20 : vector<1x128xf32>
    %23 = arith.fptosi %19 : vector<1x128xf32> to vector<1x128xi32>
    %24 = arith.fptosi %20 : vector<1x128xf32> to vector<1x128xi32>
    %25 = vector.broadcast %24 : vector<1x128xi32> to vector<16x128xi32>
    %26 = arith.cmpi eq, %9, %25 : vector<16x128xi32>
    %cst_11 = arith.constant 1.000000e+00 : f32
    %27 = vector.broadcast %cst_11 : f32 to vector<1x128xf32>
    %28 = arith.subf %27, %22 : vector<1x128xf32>
    %cst_12 = arith.constant 0.000000e+00 : f32
    %29 = vector.shape_cast %28 : vector<1x128xf32> to vector<1x128xf32>
    %30 = vector.broadcast %29 : vector<1x128xf32> to vector<16x128xf32>
    %31 = vector.broadcast %cst_12 : f32 to vector<16x128xf32>
    %32 = arith.select %26, %30, %31 : vector<16x128xi1>, vector<16x128xf32>
    %c1_i32 = arith.constant 1 : i32
    %33 = vector.broadcast %c1_i32 : i32 to vector<1x128xi32>
    %34 = arith.addi %24, %33 : vector<1x128xi32>
    %35 = vector.broadcast %34 : vector<1x128xi32> to vector<16x128xi32>
    %36 = arith.cmpi eq, %9, %35 : vector<16x128xi32>
    %cst_13 = arith.constant 0.000000e+00 : f32
    %37 = vector.shape_cast %22 : vector<1x128xf32> to vector<1x128xf32>
    %38 = vector.broadcast %37 : vector<1x128xf32> to vector<16x128xf32>
    %39 = vector.broadcast %cst_13 : f32 to vector<16x128xf32>
    %40 = arith.select %36, %38, %39 : vector<16x128xi1>, vector<16x128xf32>
    %41 = arith.addf %32, %40 : vector<16x128xf32>
    %42 = vector.broadcast %23 : vector<1x128xi32> to vector<16x128xi32>
    %43 = arith.cmpi eq, %10, %42 : vector<16x128xi32>
    %cst_14 = arith.constant 1.000000e+00 : f32
    %44 = vector.broadcast %cst_14 : f32 to vector<1x128xf32>
    %45 = arith.subf %44, %21 : vector<1x128xf32>
    %cst_15 = arith.constant 0.000000e+00 : f32
    %46 = vector.shape_cast %45 : vector<1x128xf32> to vector<1x128xf32>
    %47 = vector.broadcast %46 : vector<1x128xf32> to vector<16x128xf32>
    %48 = vector.broadcast %cst_15 : f32 to vector<16x128xf32>
    %49 = arith.select %43, %47, %48 : vector<16x128xi1>, vector<16x128xf32>
    %c1_i32_16 = arith.constant 1 : i32
    %50 = vector.broadcast %c1_i32_16 : i32 to vector<1x128xi32>
    %51 = arith.addi %23, %50 : vector<1x128xi32>
    %52 = vector.broadcast %51 : vector<1x128xi32> to vector<16x128xi32>
    %53 = arith.cmpi eq, %10, %52 : vector<16x128xi32>
    %cst_17 = arith.constant 0.000000e+00 : f32
    %54 = vector.shape_cast %21 : vector<1x128xf32> to vector<1x128xf32>
    %55 = vector.broadcast %54 : vector<1x128xf32> to vector<16x128xf32>
    %56 = vector.broadcast %cst_17 : f32 to vector<16x128xf32>
    %57 = arith.select %53, %55, %56 : vector<16x128xi1>, vector<16x128xf32>
    %58 = arith.addf %49, %57 : vector<16x128xf32>
    %cst_18 = arith.constant dense<0.000000e+00> : vector<64x128xf32>
    %59 = tpu.matmul %3, %41, %cst_18 {dimension_numbers = #tpu.dot_dimension_numbers<[1], [0], [0], [1], [0, 0, 1, 1], [], []>} : vector<64x16xf32>, vector<16x128xf32>, vector<64x128xf32> -> vector<64x128xf32>
    %60 = vector.shape_cast %59 : vector<64x128xf32> to vector<4x16x128xf32>
    %61 = vector.shape_cast %58 : vector<16x128xf32> to vector<1x16x128xf32>
    %62 = vector.broadcast %61 : vector<1x16x128xf32> to vector<4x16x128xf32>
    %63 = arith.mulf %60, %62 : vector<4x16x128xf32>
    %cst_19 = arith.constant dense<0.000000e+00> : vector<4x128xf32>
    %64 = vector.multi_reduction <add>, %63, %cst_19 [1] : vector<4x16x128xf32> to vector<4x128xf32>
    %c0_20 = arith.constant 0 : index
    %c0_21 = arith.constant 0 : index
    %65 = vector.load %arg8[%c0_20, %c0_21] : memref<36x128xf32, #tpu.memory_space<vmem>>, vector<4x128xf32>
    tpu.vector_store %arg8[%c0_20, %c0_21], %64 {strides = array<i32>} : memref<36x128xf32, #tpu.memory_space<vmem>>, vector<4x128xf32>,
    %cst_22 = arith.constant -1.000000e+00 : f32
    %66 = vector.broadcast %cst_22 : f32 to vector<1x128xf32>
    %67 = arith.addf %5, %66 : vector<1x128xf32>
    %68 = vector.extract_strided_slice %8 {offsets = [2, 0], sizes = [1, 128], strides = [1, 1]} : vector<18x128xf32> to vector<1x128xf32>
    %69 = arith.addf %67, %68 : vector<1x128xf32>
    %cst_23 = arith.constant 0.000000e+00 : f32
    %70 = vector.broadcast %cst_23 : f32 to vector<1x128xf32>
    %71 = arith.addf %6, %70 : vector<1x128xf32>
    %72 = vector.extract_strided_slice %8 {offsets = [3, 0], sizes = [1, 128], strides = [1, 1]} : vector<18x128xf32> to vector<1x128xf32>
    %73 = arith.addf %71, %72 : vector<1x128xf32>
    %74 = math.floor %69 : vector<1x128xf32>
    %75 = math.floor %73 : vector<1x128xf32>
    %76 = arith.subf %69, %74 : vector<1x128xf32>
    %77 = arith.subf %73, %75 : vector<1x128xf32>
    %78 = arith.fptosi %74 : vector<1x128xf32> to vector<1x128xi32>
    %79 = arith.fptosi %75 : vector<1x128xf32> to vector<1x128xi32>
    %80 = vector.broadcast %79 : vector<1x128xi32> to vector<16x128xi32>
    %81 = arith.cmpi eq, %9, %80 : vector<16x128xi32>
    %cst_24 = arith.constant 1.000000e+00 : f32
    %82 = vector.broadcast %cst_24 : f32 to vector<1x128xf32>
    %83 = arith.subf %82, %77 : vector<1x128xf32>
    %cst_25 = arith.constant 0.000000e+00 : f32
    %84 = vector.shape_cast %83 : vector<1x128xf32> to vector<1x128xf32>
    %85 = vector.broadcast %84 : vector<1x128xf32> to vector<16x128xf32>
    %86 = vector.broadcast %cst_25 : f32 to vector<16x128xf32>
    %87 = arith.select %81, %85, %86 : vector<16x128xi1>, vector<16x128xf32>
    %c1_i32_26 = arith.constant 1 : i32
    %88 = vector.broadcast %c1_i32_26 : i32 to vector<1x128xi32>
    %89 = arith.addi %79, %88 : vector<1x128xi32>
    %90 = vector.broadcast %89 : vector<1x128xi32> to vector<16x128xi32>
    %91 = arith.cmpi eq, %9, %90 : vector<16x128xi32>
    %cst_27 = arith.constant 0.000000e+00 : f32
    %92 = vector.shape_cast %77 : vector<1x128xf32> to vector<1x128xf32>
    %93 = vector.broadcast %92 : vector<1x128xf32> to vector<16x128xf32>
    %94 = vector.broadcast %cst_27 : f32 to vector<16x128xf32>
    %95 = arith.select %91, %93, %94 : vector<16x128xi1>, vector<16x128xf32>
    %96 = arith.addf %87, %95 : vector<16x128xf32>
    %97 = vector.broadcast %78 : vector<1x128xi32> to vector<16x128xi32>
    %98 = arith.cmpi eq, %10, %97 : vector<16x128xi32>
    %cst_28 = arith.constant 1.000000e+00 : f32
    %99 = vector.broadcast %cst_28 : f32 to vector<1x128xf32>
    %100 = arith.subf %99, %76 : vector<1x128xf32>
    %cst_29 = arith.constant 0.000000e+00 : f32
    %101 = vector.shape_cast %100 : vector<1x128xf32> to vector<1x128xf32>
    %102 = vector.broadcast %101 : vector<1x128xf32> to vector<16x128xf32>
    %103 = vector.broadcast %cst_29 : f32 to vector<16x128xf32>
    %104 = arith.select %98, %102, %103 : vector<16x128xi1>, vector<16x128xf32>
    %c1_i32_30 = arith.constant 1 : i32
    %105 = vector.broadcast %c1_i32_30 : i32 to vector<1x128xi32>
    %106 = arith.addi %78, %105 : vector<1x128xi32>
    %107 = vector.broadcast %106 : vector<1x128xi32> to vector<16x128xi32>
    %108 = arith.cmpi eq, %10, %107 : vector<16x128xi32>
    %cst_31 = arith.constant 0.000000e+00 : f32
    %109 = vector.shape_cast %76 : vector<1x128xf32> to vector<1x128xf32>
    %110 = vector.broadcast %109 : vector<1x128xf32> to vector<16x128xf32>
    %111 = vector.broadcast %cst_31 : f32 to vector<16x128xf32>
    %112 = arith.select %108, %110, %111 : vector<16x128xi1>, vector<16x128xf32>
    %113 = arith.addf %104, %112 : vector<16x128xf32>
    %cst_32 = arith.constant dense<0.000000e+00> : vector<64x128xf32>
    %114 = tpu.matmul %3, %96, %cst_32 {dimension_numbers = #tpu.dot_dimension_numbers<[1], [0], [0], [1], [0, 0, 1, 1], [], []>} : vector<64x16xf32>, vector<16x128xf32>, vector<64x128xf32> -> vector<64x128xf32>
    %115 = vector.shape_cast %114 : vector<64x128xf32> to vector<4x16x128xf32>
    %116 = vector.shape_cast %113 : vector<16x128xf32> to vector<1x16x128xf32>
    %117 = vector.broadcast %116 : vector<1x16x128xf32> to vector<4x16x128xf32>
    %118 = arith.mulf %115, %117 : vector<4x16x128xf32>
    %cst_33 = arith.constant dense<0.000000e+00> : vector<4x128xf32>
    %119 = vector.multi_reduction <add>, %118, %cst_33 [1] : vector<4x16x128xf32> to vector<4x128xf32>
    %c4 = arith.constant 4 : index
    %c0_34 = arith.constant 0 : index
    %120 = vector.load %arg8[%c4, %c0_34] : memref<36x128xf32, #tpu.memory_space<vmem>>, vector<4x128xf32>
    tpu.vector_store %arg8[%c4, %c0_34], %119 {strides = array<i32>} : memref<36x128xf32, #tpu.memory_space<vmem>>, vector<4x128xf32>,
    %cst_35 = arith.constant -1.000000e+00 : f32
    %121 = vector.broadcast %cst_35 : f32 to vector<1x128xf32>
    %122 = arith.addf %5, %121 : vector<1x128xf32>
    %123 = vector.extract_strided_slice %8 {offsets = [4, 0], sizes = [1, 128], strides = [1, 1]} : vector<18x128xf32> to vector<1x128xf32>
    %124 = arith.addf %122, %123 : vector<1x128xf32>
    %cst_36 = arith.constant 1.000000e+00 : f32
    %125 = vector.broadcast %cst_36 : f32 to vector<1x128xf32>
    %126 = arith.addf %6, %125 : vector<1x128xf32>
    %127 = vector.extract_strided_slice %8 {offsets = [5, 0], sizes = [1, 128], strides = [1, 1]} : vector<18x128xf32> to vector<1x128xf32>
    %128 = arith.addf %126, %127 : vector<1x128xf32>
    %129 = math.floor %124 : vector<1x128xf32>
    %130 = math.floor %128 : vector<1x128xf32>
    %131 = arith.subf %124, %129 : vector<1x128xf32>
    %132 = arith.subf %128, %130 : vector<1x128xf32>
    %133 = arith.fptosi %129 : vector<1x128xf32> to vector<1x128xi32>
    %134 = arith.fptosi %130 : vector<1x128xf32> to vector<1x128xi32>
    %135 = vector.broadcast %134 : vector<1x128xi32> to vector<16x128xi32>
    %136 = arith.cmpi eq, %9, %135 : vector<16x128xi32>
    %cst_37 = arith.constant 1.000000e+00 : f32
    %137 = vector.broadcast %cst_37 : f32 to vector<1x128xf32>
    %138 = arith.subf %137, %132 : vector<1x128xf32>
    %cst_38 = arith.constant 0.000000e+00 : f32
    %139 = vector.shape_cast %138 : vector<1x128xf32> to vector<1x128xf32>
    %140 = vector.broadcast %139 : vector<1x128xf32> to vector<16x128xf32>
    %141 = vector.broadcast %cst_38 : f32 to vector<16x128xf32>
    %142 = arith.select %136, %140, %141 : vector<16x128xi1>, vector<16x128xf32>
    %c1_i32_39 = arith.constant 1 : i32
    %143 = vector.broadcast %c1_i32_39 : i32 to vector<1x128xi32>
    %144 = arith.addi %134, %143 : vector<1x128xi32>
    %145 = vector.broadcast %144 : vector<1x128xi32> to vector<16x128xi32>
    %146 = arith.cmpi eq, %9, %145 : vector<16x128xi32>
    %cst_40 = arith.constant 0.000000e+00 : f32
    %147 = vector.shape_cast %132 : vector<1x128xf32> to vector<1x128xf32>
    %148 = vector.broadcast %147 : vector<1x128xf32> to vector<16x128xf32>
    %149 = vector.broadcast %cst_40 : f32 to vector<16x128xf32>
    %150 = arith.select %146, %148, %149 : vector<16x128xi1>, vector<16x128xf32>
    %151 = arith.addf %142, %150 : vector<16x128xf32>
    %152 = vector.broadcast %133 : vector<1x128xi32> to vector<16x128xi32>
    %153 = arith.cmpi eq, %10, %152 : vector<16x128xi32>
    %cst_41 = arith.constant 1.000000e+00 : f32
    %154 = vector.broadcast %cst_41 : f32 to vector<1x128xf32>
    %155 = arith.subf %154, %131 : vector<1x128xf32>
    %cst_42 = arith.constant 0.000000e+00 : f32
    %156 = vector.shape_cast %155 : vector<1x128xf32> to vector<1x128xf32>
    %157 = vector.broadcast %156 : vector<1x128xf32> to vector<16x128xf32>
    %158 = vector.broadcast %cst_42 : f32 to vector<16x128xf32>
    %159 = arith.select %153, %157, %158 : vector<16x128xi1>, vector<16x128xf32>
    %c1_i32_43 = arith.constant 1 : i32
    %160 = vector.broadcast %c1_i32_43 : i32 to vector<1x128xi32>
    %161 = arith.addi %133, %160 : vector<1x128xi32>
    %162 = vector.broadcast %161 : vector<1x128xi32> to vector<16x128xi32>
    %163 = arith.cmpi eq, %10, %162 : vector<16x128xi32>
    %cst_44 = arith.constant 0.000000e+00 : f32
    %164 = vector.shape_cast %131 : vector<1x128xf32> to vector<1x128xf32>
    %165 = vector.broadcast %164 : vector<1x128xf32> to vector<16x128xf32>
    %166 = vector.broadcast %cst_44 : f32 to vector<16x128xf32>
    %167 = arith.select %163, %165, %166 : vector<16x128xi1>, vector<16x128xf32>
    %168 = arith.addf %159, %167 : vector<16x128xf32>
    %cst_45 = arith.constant dense<0.000000e+00> : vector<64x128xf32>
    %169 = tpu.matmul %3, %151, %cst_45 {dimension_numbers = #tpu.dot_dimension_numbers<[1], [0], [0], [1], [0, 0, 1, 1], [], []>} : vector<64x16xf32>, vector<16x128xf32>, vector<64x128xf32> -> vector<64x128xf32>
    %170 = vector.shape_cast %169 : vector<64x128xf32> to vector<4x16x128xf32>
    %171 = vector.shape_cast %168 : vector<16x128xf32> to vector<1x16x128xf32>
    %172 = vector.broadcast %171 : vector<1x16x128xf32> to vector<4x16x128xf32>
    %173 = arith.mulf %170, %172 : vector<4x16x128xf32>
    %cst_46 = arith.constant dense<0.000000e+00> : vector<4x128xf32>
    %174 = vector.multi_reduction <add>, %173, %cst_46 [1] : vector<4x16x128xf32> to vector<4x128xf32>
    %c8 = arith.constant 8 : index
    %c0_47 = arith.constant 0 : index
    %175 = vector.load %arg8[%c8, %c0_47] : memref<36x128xf32, #tpu.memory_space<vmem>>, vector<4x128xf32>
    tpu.vector_store %arg8[%c8, %c0_47], %174 {strides = array<i32>} : memref<36x128xf32, #tpu.memory_space<vmem>>, vector<4x128xf32>,
    %cst_48 = arith.constant 0.000000e+00 : f32
    %176 = vector.broadcast %cst_48 : f32 to vector<1x128xf32>
    %177 = arith.addf %5, %176 : vector<1x128xf32>
    %178 = vector.extract_strided_slice %8 {offsets = [6, 0], sizes = [1, 128], strides = [1, 1]} : vector<18x128xf32> to vector<1x128xf32>
    %179 = arith.addf %177, %178 : vector<1x128xf32>
    %cst_49 = arith.constant -1.000000e+00 : f32
    %180 = vector.broadcast %cst_49 : f32 to vector<1x128xf32>
    %181 = arith.addf %6, %180 : vector<1x128xf32>
    %182 = vector.extract_strided_slice %8 {offsets = [7, 0], sizes = [1, 128], strides = [1, 1]} : vector<18x128xf32> to vector<1x128xf32>
    %183 = arith.addf %181, %182 : vector<1x128xf32>
    %184 = math.floor %179 : vector<1x128xf32>
    %185 = math.floor %183 : vector<1x128xf32>
    %186 = arith.subf %179, %184 : vector<1x128xf32>
    %187 = arith.subf %183, %185 : vector<1x128xf32>
    %188 = arith.fptosi %184 : vector<1x128xf32> to vector<1x128xi32>
    %189 = arith.fptosi %185 : vector<1x128xf32> to vector<1x128xi32>
    %190 = vector.broadcast %189 : vector<1x128xi32> to vector<16x128xi32>
    %191 = arith.cmpi eq, %9, %190 : vector<16x128xi32>
    %cst_50 = arith.constant 1.000000e+00 : f32
    %192 = vector.broadcast %cst_50 : f32 to vector<1x128xf32>
    %193 = arith.subf %192, %187 : vector<1x128xf32>
    %cst_51 = arith.constant 0.000000e+00 : f32
    %194 = vector.shape_cast %193 : vector<1x128xf32> to vector<1x128xf32>
    %195 = vector.broadcast %194 : vector<1x128xf32> to vector<16x128xf32>
    %196 = vector.broadcast %cst_51 : f32 to vector<16x128xf32>
    %197 = arith.select %191, %195, %196 : vector<16x128xi1>, vector<16x128xf32>
    %c1_i32_52 = arith.constant 1 : i32
    %198 = vector.broadcast %c1_i32_52 : i32 to vector<1x128xi32>
    %199 = arith.addi %189, %198 : vector<1x128xi32>
    %200 = vector.broadcast %199 : vector<1x128xi32> to vector<16x128xi32>
    %201 = arith.cmpi eq, %9, %200 : vector<16x128xi32>
    %cst_53 = arith.constant 0.000000e+00 : f32
    %202 = vector.shape_cast %187 : vector<1x128xf32> to vector<1x128xf32>
    %203 = vector.broadcast %202 : vector<1x128xf32> to vector<16x128xf32>
    %204 = vector.broadcast %cst_53 : f32 to vector<16x128xf32>
    %205 = arith.select %201, %203, %204 : vector<16x128xi1>, vector<16x128xf32>
    %206 = arith.addf %197, %205 : vector<16x128xf32>
    %207 = vector.broadcast %188 : vector<1x128xi32> to vector<16x128xi32>
    %208 = arith.cmpi eq, %10, %207 : vector<16x128xi32>
    %cst_54 = arith.constant 1.000000e+00 : f32
    %209 = vector.broadcast %cst_54 : f32 to vector<1x128xf32>
    %210 = arith.subf %209, %186 : vector<1x128xf32>
    %cst_55 = arith.constant 0.000000e+00 : f32
    %211 = vector.shape_cast %210 : vector<1x128xf32> to vector<1x128xf32>
    %212 = vector.broadcast %211 : vector<1x128xf32> to vector<16x128xf32>
    %213 = vector.broadcast %cst_55 : f32 to vector<16x128xf32>
    %214 = arith.select %208, %212, %213 : vector<16x128xi1>, vector<16x128xf32>
    %c1_i32_56 = arith.constant 1 : i32
    %215 = vector.broadcast %c1_i32_56 : i32 to vector<1x128xi32>
    %216 = arith.addi %188, %215 : vector<1x128xi32>
    %217 = vector.broadcast %216 : vector<1x128xi32> to vector<16x128xi32>
    %218 = arith.cmpi eq, %10, %217 : vector<16x128xi32>
    %cst_57 = arith.constant 0.000000e+00 : f32
    %219 = vector.shape_cast %186 : vector<1x128xf32> to vector<1x128xf32>
    %220 = vector.broadcast %219 : vector<1x128xf32> to vector<16x128xf32>
    %221 = vector.broadcast %cst_57 : f32 to vector<16x128xf32>
    %222 = arith.select %218, %220, %221 : vector<16x128xi1>, vector<16x128xf32>
    %223 = arith.addf %214, %222 : vector<16x128xf32>
    %cst_58 = arith.constant dense<0.000000e+00> : vector<64x128xf32>
    %224 = tpu.matmul %3, %206, %cst_58 {dimension_numbers = #tpu.dot_dimension_numbers<[1], [0], [0], [1], [0, 0, 1, 1], [], []>} : vector<64x16xf32>, vector<16x128xf32>, vector<64x128xf32> -> vector<64x128xf32>
    %225 = vector.shape_cast %224 : vector<64x128xf32> to vector<4x16x128xf32>
    %226 = vector.shape_cast %223 : vector<16x128xf32> to vector<1x16x128xf32>
    %227 = vector.broadcast %226 : vector<1x16x128xf32> to vector<4x16x128xf32>
    %228 = arith.mulf %225, %227 : vector<4x16x128xf32>
    %cst_59 = arith.constant dense<0.000000e+00> : vector<4x128xf32>
    %229 = vector.multi_reduction <add>, %228, %cst_59 [1] : vector<4x16x128xf32> to vector<4x128xf32>
    %c12 = arith.constant 12 : index
    %c0_60 = arith.constant 0 : index
    %230 = vector.load %arg8[%c12, %c0_60] : memref<36x128xf32, #tpu.memory_space<vmem>>, vector<4x128xf32>
    tpu.vector_store %arg8[%c12, %c0_60], %229 {strides = array<i32>} : memref<36x128xf32, #tpu.memory_space<vmem>>, vector<4x128xf32>,
    %cst_61 = arith.constant 0.000000e+00 : f32
    %231 = vector.broadcast %cst_61 : f32 to vector<1x128xf32>
    %232 = arith.addf %5, %231 : vector<1x128xf32>
    %233 = vector.extract_strided_slice %8 {offsets = [8, 0], sizes = [1, 128], strides = [1, 1]} : vector<18x128xf32> to vector<1x128xf32>
    %234 = arith.addf %232, %233 : vector<1x128xf32>
    %cst_62 = arith.constant 0.000000e+00 : f32
    %235 = vector.broadcast %cst_62 : f32 to vector<1x128xf32>
    %236 = arith.addf %6, %235 : vector<1x128xf32>
    %237 = vector.extract_strided_slice %8 {offsets = [9, 0], sizes = [1, 128], strides = [1, 1]} : vector<18x128xf32> to vector<1x128xf32>
    %238 = arith.addf %236, %237 : vector<1x128xf32>
    %239 = math.floor %234 : vector<1x128xf32>
    %240 = math.floor %238 : vector<1x128xf32>
    %241 = arith.subf %234, %239 : vector<1x128xf32>
    %242 = arith.subf %238, %240 : vector<1x128xf32>
    %243 = arith.fptosi %239 : vector<1x128xf32> to vector<1x128xi32>
    %244 = arith.fptosi %240 : vector<1x128xf32> to vector<1x128xi32>
    %245 = vector.broadcast %244 : vector<1x128xi32> to vector<16x128xi32>
    %246 = arith.cmpi eq, %9, %245 : vector<16x128xi32>
    %cst_63 = arith.constant 1.000000e+00 : f32
    %247 = vector.broadcast %cst_63 : f32 to vector<1x128xf32>
    %248 = arith.subf %247, %242 : vector<1x128xf32>
    %cst_64 = arith.constant 0.000000e+00 : f32
    %249 = vector.shape_cast %248 : vector<1x128xf32> to vector<1x128xf32>
    %250 = vector.broadcast %249 : vector<1x128xf32> to vector<16x128xf32>
    %251 = vector.broadcast %cst_64 : f32 to vector<16x128xf32>
    %252 = arith.select %246, %250, %251 : vector<16x128xi1>, vector<16x128xf32>
    %c1_i32_65 = arith.constant 1 : i32
    %253 = vector.broadcast %c1_i32_65 : i32 to vector<1x128xi32>
    %254 = arith.addi %244, %253 : vector<1x128xi32>
    %255 = vector.broadcast %254 : vector<1x128xi32> to vector<16x128xi32>
    %256 = arith.cmpi eq, %9, %255 : vector<16x128xi32>
    %cst_66 = arith.constant 0.000000e+00 : f32
    %257 = vector.shape_cast %242 : vector<1x128xf32> to vector<1x128xf32>
    %258 = vector.broadcast %257 : vector<1x128xf32> to vector<16x128xf32>
    %259 = vector.broadcast %cst_66 : f32 to vector<16x128xf32>
    %260 = arith.select %256, %258, %259 : vector<16x128xi1>, vector<16x128xf32>
    %261 = arith.addf %252, %260 : vector<16x128xf32>
    %262 = vector.broadcast %243 : vector<1x128xi32> to vector<16x128xi32>
    %263 = arith.cmpi eq, %10, %262 : vector<16x128xi32>
    %cst_67 = arith.constant 1.000000e+00 : f32
    %264 = vector.broadcast %cst_67 : f32 to vector<1x128xf32>
    %265 = arith.subf %264, %241 : vector<1x128xf32>
    %cst_68 = arith.constant 0.000000e+00 : f32
    %266 = vector.shape_cast %265 : vector<1x128xf32> to vector<1x128xf32>
    %267 = vector.broadcast %266 : vector<1x128xf32> to vector<16x128xf32>
    %268 = vector.broadcast %cst_68 : f32 to vector<16x128xf32>
    %269 = arith.select %263, %267, %268 : vector<16x128xi1>, vector<16x128xf32>
    %c1_i32_69 = arith.constant 1 : i32
    %270 = vector.broadcast %c1_i32_69 : i32 to vector<1x128xi32>
    %271 = arith.addi %243, %270 : vector<1x128xi32>
    %272 = vector.broadcast %271 : vector<1x128xi32> to vector<16x128xi32>
    %273 = arith.cmpi eq, %10, %272 : vector<16x128xi32>
    %cst_70 = arith.constant 0.000000e+00 : f32
    %274 = vector.shape_cast %241 : vector<1x128xf32> to vector<1x128xf32>
    %275 = vector.broadcast %274 : vector<1x128xf32> to vector<16x128xf32>
    %276 = vector.broadcast %cst_70 : f32 to vector<16x128xf32>
    %277 = arith.select %273, %275, %276 : vector<16x128xi1>, vector<16x128xf32>
    %278 = arith.addf %269, %277 : vector<16x128xf32>
    %cst_71 = arith.constant dense<0.000000e+00> : vector<64x128xf32>
    %279 = tpu.matmul %3, %261, %cst_71 {dimension_numbers = #tpu.dot_dimension_numbers<[1], [0], [0], [1], [0, 0, 1, 1], [], []>} : vector<64x16xf32>, vector<16x128xf32>, vector<64x128xf32> -> vector<64x128xf32>
    %280 = vector.shape_cast %279 : vector<64x128xf32> to vector<4x16x128xf32>
    %281 = vector.shape_cast %278 : vector<16x128xf32> to vector<1x16x128xf32>
    %282 = vector.broadcast %281 : vector<1x16x128xf32> to vector<4x16x128xf32>
    %283 = arith.mulf %280, %282 : vector<4x16x128xf32>
    %cst_72 = arith.constant dense<0.000000e+00> : vector<4x128xf32>
    %284 = vector.multi_reduction <add>, %283, %cst_72 [1] : vector<4x16x128xf32> to vector<4x128xf32>
    %c16 = arith.constant 16 : index
    %c0_73 = arith.constant 0 : index
    %285 = vector.load %arg8[%c16, %c0_73] : memref<36x128xf32, #tpu.memory_space<vmem>>, vector<4x128xf32>
    tpu.vector_store %arg8[%c16, %c0_73], %284 {strides = array<i32>} : memref<36x128xf32, #tpu.memory_space<vmem>>, vector<4x128xf32>,
    %cst_74 = arith.constant 0.000000e+00 : f32
    %286 = vector.broadcast %cst_74 : f32 to vector<1x128xf32>
    %287 = arith.addf %5, %286 : vector<1x128xf32>
    %288 = vector.extract_strided_slice %8 {offsets = [10, 0], sizes = [1, 128], strides = [1, 1]} : vector<18x128xf32> to vector<1x128xf32>
    %289 = arith.addf %287, %288 : vector<1x128xf32>
    %cst_75 = arith.constant 1.000000e+00 : f32
    %290 = vector.broadcast %cst_75 : f32 to vector<1x128xf32>
    %291 = arith.addf %6, %290 : vector<1x128xf32>
    %292 = vector.extract_strided_slice %8 {offsets = [11, 0], sizes = [1, 128], strides = [1, 1]} : vector<18x128xf32> to vector<1x128xf32>
    %293 = arith.addf %291, %292 : vector<1x128xf32>
    %294 = math.floor %289 : vector<1x128xf32>
    %295 = math.floor %293 : vector<1x128xf32>
    %296 = arith.subf %289, %294 : vector<1x128xf32>
    %297 = arith.subf %293, %295 : vector<1x128xf32>
    %298 = arith.fptosi %294 : vector<1x128xf32> to vector<1x128xi32>
    %299 = arith.fptosi %295 : vector<1x128xf32> to vector<1x128xi32>
    %300 = vector.broadcast %299 : vector<1x128xi32> to vector<16x128xi32>
    %301 = arith.cmpi eq, %9, %300 : vector<16x128xi32>
    %cst_76 = arith.constant 1.000000e+00 : f32
    %302 = vector.broadcast %cst_76 : f32 to vector<1x128xf32>
    %303 = arith.subf %302, %297 : vector<1x128xf32>
    %cst_77 = arith.constant 0.000000e+00 : f32
    %304 = vector.shape_cast %303 : vector<1x128xf32> to vector<1x128xf32>
    %305 = vector.broadcast %304 : vector<1x128xf32> to vector<16x128xf32>
    %306 = vector.broadcast %cst_77 : f32 to vector<16x128xf32>
    %307 = arith.select %301, %305, %306 : vector<16x128xi1>, vector<16x128xf32>
    %c1_i32_78 = arith.constant 1 : i32
    %308 = vector.broadcast %c1_i32_78 : i32 to vector<1x128xi32>
    %309 = arith.addi %299, %308 : vector<1x128xi32>
    %310 = vector.broadcast %309 : vector<1x128xi32> to vector<16x128xi32>
    %311 = arith.cmpi eq, %9, %310 : vector<16x128xi32>
    %cst_79 = arith.constant 0.000000e+00 : f32
    %312 = vector.shape_cast %297 : vector<1x128xf32> to vector<1x128xf32>
    %313 = vector.broadcast %312 : vector<1x128xf32> to vector<16x128xf32>
    %314 = vector.broadcast %cst_79 : f32 to vector<16x128xf32>
    %315 = arith.select %311, %313, %314 : vector<16x128xi1>, vector<16x128xf32>
    %316 = arith.addf %307, %315 : vector<16x128xf32>
    %317 = vector.broadcast %298 : vector<1x128xi32> to vector<16x128xi32>
    %318 = arith.cmpi eq, %10, %317 : vector<16x128xi32>
    %cst_80 = arith.constant 1.000000e+00 : f32
    %319 = vector.broadcast %cst_80 : f32 to vector<1x128xf32>
    %320 = arith.subf %319, %296 : vector<1x128xf32>
    %cst_81 = arith.constant 0.000000e+00 : f32
    %321 = vector.shape_cast %320 : vector<1x128xf32> to vector<1x128xf32>
    %322 = vector.broadcast %321 : vector<1x128xf32> to vector<16x128xf32>
    %323 = vector.broadcast %cst_81 : f32 to vector<16x128xf32>
    %324 = arith.select %318, %322, %323 : vector<16x128xi1>, vector<16x128xf32>
    %c1_i32_82 = arith.constant 1 : i32
    %325 = vector.broadcast %c1_i32_82 : i32 to vector<1x128xi32>
    %326 = arith.addi %298, %325 : vector<1x128xi32>
    %327 = vector.broadcast %326 : vector<1x128xi32> to vector<16x128xi32>
    %328 = arith.cmpi eq, %10, %327 : vector<16x128xi32>
    %cst_83 = arith.constant 0.000000e+00 : f32
    %329 = vector.shape_cast %296 : vector<1x128xf32> to vector<1x128xf32>
    %330 = vector.broadcast %329 : vector<1x128xf32> to vector<16x128xf32>
    %331 = vector.broadcast %cst_83 : f32 to vector<16x128xf32>
    %332 = arith.select %328, %330, %331 : vector<16x128xi1>, vector<16x128xf32>
    %333 = arith.addf %324, %332 : vector<16x128xf32>
    %cst_84 = arith.constant dense<0.000000e+00> : vector<64x128xf32>
    %334 = tpu.matmul %3, %316, %cst_84 {dimension_numbers = #tpu.dot_dimension_numbers<[1], [0], [0], [1], [0, 0, 1, 1], [], []>} : vector<64x16xf32>, vector<16x128xf32>, vector<64x128xf32> -> vector<64x128xf32>
    %335 = vector.shape_cast %334 : vector<64x128xf32> to vector<4x16x128xf32>
    %336 = vector.shape_cast %333 : vector<16x128xf32> to vector<1x16x128xf32>
    %337 = vector.broadcast %336 : vector<1x16x128xf32> to vector<4x16x128xf32>
    %338 = arith.mulf %335, %337 : vector<4x16x128xf32>
    %cst_85 = arith.constant dense<0.000000e+00> : vector<4x128xf32>
    %339 = vector.multi_reduction <add>, %338, %cst_85 [1] : vector<4x16x128xf32> to vector<4x128xf32>
    %c20 = arith.constant 20 : index
    %c0_86 = arith.constant 0 : index
    %340 = vector.load %arg8[%c20, %c0_86] : memref<36x128xf32, #tpu.memory_space<vmem>>, vector<4x128xf32>
    tpu.vector_store %arg8[%c20, %c0_86], %339 {strides = array<i32>} : memref<36x128xf32, #tpu.memory_space<vmem>>, vector<4x128xf32>,
    %cst_87 = arith.constant 1.000000e+00 : f32
    %341 = vector.broadcast %cst_87 : f32 to vector<1x128xf32>
    %342 = arith.addf %5, %341 : vector<1x128xf32>
    %343 = vector.extract_strided_slice %8 {offsets = [12, 0], sizes = [1, 128], strides = [1, 1]} : vector<18x128xf32> to vector<1x128xf32>
    %344 = arith.addf %342, %343 : vector<1x128xf32>
    %cst_88 = arith.constant -1.000000e+00 : f32
    %345 = vector.broadcast %cst_88 : f32 to vector<1x128xf32>
    %346 = arith.addf %6, %345 : vector<1x128xf32>
    %347 = vector.extract_strided_slice %8 {offsets = [13, 0], sizes = [1, 128], strides = [1, 1]} : vector<18x128xf32> to vector<1x128xf32>
    %348 = arith.addf %346, %347 : vector<1x128xf32>
    %349 = math.floor %344 : vector<1x128xf32>
    %350 = math.floor %348 : vector<1x128xf32>
    %351 = arith.subf %344, %349 : vector<1x128xf32>
    %352 = arith.subf %348, %350 : vector<1x128xf32>
    %353 = arith.fptosi %349 : vector<1x128xf32> to vector<1x128xi32>
    %354 = arith.fptosi %350 : vector<1x128xf32> to vector<1x128xi32>
    %355 = vector.broadcast %354 : vector<1x128xi32> to vector<16x128xi32>
    %356 = arith.cmpi eq, %9, %355 : vector<16x128xi32>
    %cst_89 = arith.constant 1.000000e+00 : f32
    %357 = vector.broadcast %cst_89 : f32 to vector<1x128xf32>
    %358 = arith.subf %357, %352 : vector<1x128xf32>
    %cst_90 = arith.constant 0.000000e+00 : f32
    %359 = vector.shape_cast %358 : vector<1x128xf32> to vector<1x128xf32>
    %360 = vector.broadcast %359 : vector<1x128xf32> to vector<16x128xf32>
    %361 = vector.broadcast %cst_90 : f32 to vector<16x128xf32>
    %362 = arith.select %356, %360, %361 : vector<16x128xi1>, vector<16x128xf32>
    %c1_i32_91 = arith.constant 1 : i32
    %363 = vector.broadcast %c1_i32_91 : i32 to vector<1x128xi32>
    %364 = arith.addi %354, %363 : vector<1x128xi32>
    %365 = vector.broadcast %364 : vector<1x128xi32> to vector<16x128xi32>
    %366 = arith.cmpi eq, %9, %365 : vector<16x128xi32>
    %cst_92 = arith.constant 0.000000e+00 : f32
    %367 = vector.shape_cast %352 : vector<1x128xf32> to vector<1x128xf32>
    %368 = vector.broadcast %367 : vector<1x128xf32> to vector<16x128xf32>
    %369 = vector.broadcast %cst_92 : f32 to vector<16x128xf32>
    %370 = arith.select %366, %368, %369 : vector<16x128xi1>, vector<16x128xf32>
    %371 = arith.addf %362, %370 : vector<16x128xf32>
    %372 = vector.broadcast %353 : vector<1x128xi32> to vector<16x128xi32>
    %373 = arith.cmpi eq, %10, %372 : vector<16x128xi32>
    %cst_93 = arith.constant 1.000000e+00 : f32
    %374 = vector.broadcast %cst_93 : f32 to vector<1x128xf32>
    %375 = arith.subf %374, %351 : vector<1x128xf32>
    %cst_94 = arith.constant 0.000000e+00 : f32
    %376 = vector.shape_cast %375 : vector<1x128xf32> to vector<1x128xf32>
    %377 = vector.broadcast %376 : vector<1x128xf32> to vector<16x128xf32>
    %378 = vector.broadcast %cst_94 : f32 to vector<16x128xf32>
    %379 = arith.select %373, %377, %378 : vector<16x128xi1>, vector<16x128xf32>
    %c1_i32_95 = arith.constant 1 : i32
    %380 = vector.broadcast %c1_i32_95 : i32 to vector<1x128xi32>
    %381 = arith.addi %353, %380 : vector<1x128xi32>
    %382 = vector.broadcast %381 : vector<1x128xi32> to vector<16x128xi32>
    %383 = arith.cmpi eq, %10, %382 : vector<16x128xi32>
    %cst_96 = arith.constant 0.000000e+00 : f32
    %384 = vector.shape_cast %351 : vector<1x128xf32> to vector<1x128xf32>
    %385 = vector.broadcast %384 : vector<1x128xf32> to vector<16x128xf32>
    %386 = vector.broadcast %cst_96 : f32 to vector<16x128xf32>
    %387 = arith.select %383, %385, %386 : vector<16x128xi1>, vector<16x128xf32>
    %388 = arith.addf %379, %387 : vector<16x128xf32>
    %cst_97 = arith.constant dense<0.000000e+00> : vector<64x128xf32>
    %389 = tpu.matmul %3, %371, %cst_97 {dimension_numbers = #tpu.dot_dimension_numbers<[1], [0], [0], [1], [0, 0, 1, 1], [], []>} : vector<64x16xf32>, vector<16x128xf32>, vector<64x128xf32> -> vector<64x128xf32>
    %390 = vector.shape_cast %389 : vector<64x128xf32> to vector<4x16x128xf32>
    %391 = vector.shape_cast %388 : vector<16x128xf32> to vector<1x16x128xf32>
    %392 = vector.broadcast %391 : vector<1x16x128xf32> to vector<4x16x128xf32>
    %393 = arith.mulf %390, %392 : vector<4x16x128xf32>
    %cst_98 = arith.constant dense<0.000000e+00> : vector<4x128xf32>
    %394 = vector.multi_reduction <add>, %393, %cst_98 [1] : vector<4x16x128xf32> to vector<4x128xf32>
    %c24 = arith.constant 24 : index
    %c0_99 = arith.constant 0 : index
    %395 = vector.load %arg8[%c24, %c0_99] : memref<36x128xf32, #tpu.memory_space<vmem>>, vector<4x128xf32>
    tpu.vector_store %arg8[%c24, %c0_99], %394 {strides = array<i32>} : memref<36x128xf32, #tpu.memory_space<vmem>>, vector<4x128xf32>,
    %cst_100 = arith.constant 1.000000e+00 : f32
    %396 = vector.broadcast %cst_100 : f32 to vector<1x128xf32>
    %397 = arith.addf %5, %396 : vector<1x128xf32>
    %398 = vector.extract_strided_slice %8 {offsets = [14, 0], sizes = [1, 128], strides = [1, 1]} : vector<18x128xf32> to vector<1x128xf32>
    %399 = arith.addf %397, %398 : vector<1x128xf32>
    %cst_101 = arith.constant 0.000000e+00 : f32
    %400 = vector.broadcast %cst_101 : f32 to vector<1x128xf32>
    %401 = arith.addf %6, %400 : vector<1x128xf32>
    %402 = vector.extract_strided_slice %8 {offsets = [15, 0], sizes = [1, 128], strides = [1, 1]} : vector<18x128xf32> to vector<1x128xf32>
    %403 = arith.addf %401, %402 : vector<1x128xf32>
    %404 = math.floor %399 : vector<1x128xf32>
    %405 = math.floor %403 : vector<1x128xf32>
    %406 = arith.subf %399, %404 : vector<1x128xf32>
    %407 = arith.subf %403, %405 : vector<1x128xf32>
    %408 = arith.fptosi %404 : vector<1x128xf32> to vector<1x128xi32>
    %409 = arith.fptosi %405 : vector<1x128xf32> to vector<1x128xi32>
    %410 = vector.broadcast %409 : vector<1x128xi32> to vector<16x128xi32>
    %411 = arith.cmpi eq, %9, %410 : vector<16x128xi32>
    %cst_102 = arith.constant 1.000000e+00 : f32
    %412 = vector.broadcast %cst_102 : f32 to vector<1x128xf32>
    %413 = arith.subf %412, %407 : vector<1x128xf32>
    %cst_103 = arith.constant 0.000000e+00 : f32
    %414 = vector.shape_cast %413 : vector<1x128xf32> to vector<1x128xf32>
    %415 = vector.broadcast %414 : vector<1x128xf32> to vector<16x128xf32>
    %416 = vector.broadcast %cst_103 : f32 to vector<16x128xf32>
    %417 = arith.select %411, %415, %416 : vector<16x128xi1>, vector<16x128xf32>
    %c1_i32_104 = arith.constant 1 : i32
    %418 = vector.broadcast %c1_i32_104 : i32 to vector<1x128xi32>
    %419 = arith.addi %409, %418 : vector<1x128xi32>
    %420 = vector.broadcast %419 : vector<1x128xi32> to vector<16x128xi32>
    %421 = arith.cmpi eq, %9, %420 : vector<16x128xi32>
    %cst_105 = arith.constant 0.000000e+00 : f32
    %422 = vector.shape_cast %407 : vector<1x128xf32> to vector<1x128xf32>
    %423 = vector.broadcast %422 : vector<1x128xf32> to vector<16x128xf32>
    %424 = vector.broadcast %cst_105 : f32 to vector<16x128xf32>
    %425 = arith.select %421, %423, %424 : vector<16x128xi1>, vector<16x128xf32>
    %426 = arith.addf %417, %425 : vector<16x128xf32>
    %427 = vector.broadcast %408 : vector<1x128xi32> to vector<16x128xi32>
    %428 = arith.cmpi eq, %10, %427 : vector<16x128xi32>
    %cst_106 = arith.constant 1.000000e+00 : f32
    %429 = vector.broadcast %cst_106 : f32 to vector<1x128xf32>
    %430 = arith.subf %429, %406 : vector<1x128xf32>
    %cst_107 = arith.constant 0.000000e+00 : f32
    %431 = vector.shape_cast %430 : vector<1x128xf32> to vector<1x128xf32>
    %432 = vector.broadcast %431 : vector<1x128xf32> to vector<16x128xf32>
    %433 = vector.broadcast %cst_107 : f32 to vector<16x128xf32>
    %434 = arith.select %428, %432, %433 : vector<16x128xi1>, vector<16x128xf32>
    %c1_i32_108 = arith.constant 1 : i32
    %435 = vector.broadcast %c1_i32_108 : i32 to vector<1x128xi32>
    %436 = arith.addi %408, %435 : vector<1x128xi32>
    %437 = vector.broadcast %436 : vector<1x128xi32> to vector<16x128xi32>
    %438 = arith.cmpi eq, %10, %437 : vector<16x128xi32>
    %cst_109 = arith.constant 0.000000e+00 : f32
    %439 = vector.shape_cast %406 : vector<1x128xf32> to vector<1x128xf32>
    %440 = vector.broadcast %439 : vector<1x128xf32> to vector<16x128xf32>
    %441 = vector.broadcast %cst_109 : f32 to vector<16x128xf32>
    %442 = arith.select %438, %440, %441 : vector<16x128xi1>, vector<16x128xf32>
    %443 = arith.addf %434, %442 : vector<16x128xf32>
    %cst_110 = arith.constant dense<0.000000e+00> : vector<64x128xf32>
    %444 = tpu.matmul %3, %426, %cst_110 {dimension_numbers = #tpu.dot_dimension_numbers<[1], [0], [0], [1], [0, 0, 1, 1], [], []>} : vector<64x16xf32>, vector<16x128xf32>, vector<64x128xf32> -> vector<64x128xf32>
    %445 = vector.shape_cast %444 : vector<64x128xf32> to vector<4x16x128xf32>
    %446 = vector.shape_cast %443 : vector<16x128xf32> to vector<1x16x128xf32>
    %447 = vector.broadcast %446 : vector<1x16x128xf32> to vector<4x16x128xf32>
    %448 = arith.mulf %445, %447 : vector<4x16x128xf32>
    %cst_111 = arith.constant dense<0.000000e+00> : vector<4x128xf32>
    %449 = vector.multi_reduction <add>, %448, %cst_111 [1] : vector<4x16x128xf32> to vector<4x128xf32>
    %c28 = arith.constant 28 : index
    %c0_112 = arith.constant 0 : index
    %450 = vector.load %arg8[%c28, %c0_112] : memref<36x128xf32, #tpu.memory_space<vmem>>, vector<4x128xf32>
    tpu.vector_store %arg8[%c28, %c0_112], %449 {strides = array<i32>} : memref<36x128xf32, #tpu.memory_space<vmem>>, vector<4x128xf32>,
    %cst_113 = arith.constant 1.000000e+00 : f32
    %451 = vector.broadcast %cst_113 : f32 to vector<1x128xf32>
    %452 = arith.addf %5, %451 : vector<1x128xf32>
    %453 = vector.extract_strided_slice %8 {offsets = [16, 0], sizes = [1, 128], strides = [1, 1]} : vector<18x128xf32> to vector<1x128xf32>
    %454 = arith.addf %452, %453 : vector<1x128xf32>
    %cst_114 = arith.constant 1.000000e+00 : f32
    %455 = vector.broadcast %cst_114 : f32 to vector<1x128xf32>
    %456 = arith.addf %6, %455 : vector<1x128xf32>
    %457 = vector.extract_strided_slice %8 {offsets = [17, 0], sizes = [1, 128], strides = [1, 1]} : vector<18x128xf32> to vector<1x128xf32>
    %458 = arith.addf %456, %457 : vector<1x128xf32>
    %459 = math.floor %454 : vector<1x128xf32>
    %460 = math.floor %458 : vector<1x128xf32>
    %461 = arith.subf %454, %459 : vector<1x128xf32>
    %462 = arith.subf %458, %460 : vector<1x128xf32>
    %463 = arith.fptosi %459 : vector<1x128xf32> to vector<1x128xi32>
    %464 = arith.fptosi %460 : vector<1x128xf32> to vector<1x128xi32>
    %465 = vector.broadcast %464 : vector<1x128xi32> to vector<16x128xi32>
    %466 = arith.cmpi eq, %9, %465 : vector<16x128xi32>
    %cst_115 = arith.constant 1.000000e+00 : f32
    %467 = vector.broadcast %cst_115 : f32 to vector<1x128xf32>
    %468 = arith.subf %467, %462 : vector<1x128xf32>
    %cst_116 = arith.constant 0.000000e+00 : f32
    %469 = vector.shape_cast %468 : vector<1x128xf32> to vector<1x128xf32>
    %470 = vector.broadcast %469 : vector<1x128xf32> to vector<16x128xf32>
    %471 = vector.broadcast %cst_116 : f32 to vector<16x128xf32>
    %472 = arith.select %466, %470, %471 : vector<16x128xi1>, vector<16x128xf32>
    %c1_i32_117 = arith.constant 1 : i32
    %473 = vector.broadcast %c1_i32_117 : i32 to vector<1x128xi32>
    %474 = arith.addi %464, %473 : vector<1x128xi32>
    %475 = vector.broadcast %474 : vector<1x128xi32> to vector<16x128xi32>
    %476 = arith.cmpi eq, %9, %475 : vector<16x128xi32>
    %cst_118 = arith.constant 0.000000e+00 : f32
    %477 = vector.shape_cast %462 : vector<1x128xf32> to vector<1x128xf32>
    %478 = vector.broadcast %477 : vector<1x128xf32> to vector<16x128xf32>
    %479 = vector.broadcast %cst_118 : f32 to vector<16x128xf32>
    %480 = arith.select %476, %478, %479 : vector<16x128xi1>, vector<16x128xf32>
    %481 = arith.addf %472, %480 : vector<16x128xf32>
    %482 = vector.broadcast %463 : vector<1x128xi32> to vector<16x128xi32>
    %483 = arith.cmpi eq, %10, %482 : vector<16x128xi32>
    %cst_119 = arith.constant 1.000000e+00 : f32
    %484 = vector.broadcast %cst_119 : f32 to vector<1x128xf32>
    %485 = arith.subf %484, %461 : vector<1x128xf32>
    %cst_120 = arith.constant 0.000000e+00 : f32
    %486 = vector.shape_cast %485 : vector<1x128xf32> to vector<1x128xf32>
    %487 = vector.broadcast %486 : vector<1x128xf32> to vector<16x128xf32>
    %488 = vector.broadcast %cst_120 : f32 to vector<16x128xf32>
    %489 = arith.select %483, %487, %488 : vector<16x128xi1>, vector<16x128xf32>
    %c1_i32_121 = arith.constant 1 : i32
    %490 = vector.broadcast %c1_i32_121 : i32 to vector<1x128xi32>
    %491 = arith.addi %463, %490 : vector<1x128xi32>
    %492 = vector.broadcast %491 : vector<1x128xi32> to vector<16x128xi32>
    %493 = arith.cmpi eq, %10, %492 : vector<16x128xi32>
    %cst_122 = arith.constant 0.000000e+00 : f32
    %494 = vector.shape_cast %461 : vector<1x128xf32> to vector<1x128xf32>
    %495 = vector.broadcast %494 : vector<1x128xf32> to vector<16x128xf32>
    %496 = vector.broadcast %cst_122 : f32 to vector<16x128xf32>
    %497 = arith.select %493, %495, %496 : vector<16x128xi1>, vector<16x128xf32>
    %498 = arith.addf %489, %497 : vector<16x128xf32>
    %cst_123 = arith.constant dense<0.000000e+00> : vector<64x128xf32>
    %499 = tpu.matmul %3, %481, %cst_123 {dimension_numbers = #tpu.dot_dimension_numbers<[1], [0], [0], [1], [0, 0, 1, 1], [], []>} : vector<64x16xf32>, vector<16x128xf32>, vector<64x128xf32> -> vector<64x128xf32>
    %500 = vector.shape_cast %499 : vector<64x128xf32> to vector<4x16x128xf32>
    %501 = vector.shape_cast %498 : vector<16x128xf32> to vector<1x16x128xf32>
    %502 = vector.broadcast %501 : vector<1x16x128xf32> to vector<4x16x128xf32>
    %503 = arith.mulf %500, %502 : vector<4x16x128xf32>
    %cst_124 = arith.constant dense<0.000000e+00> : vector<4x128xf32>
    %504 = vector.multi_reduction <add>, %503, %cst_124 [1] : vector<4x16x128xf32> to vector<4x128xf32>
    %c32 = arith.constant 32 : index
    %c0_125 = arith.constant 0 : index
    %505 = vector.load %arg8[%c32, %c0_125] : memref<36x128xf32, #tpu.memory_space<vmem>>, vector<4x128xf32>
    tpu.vector_store %arg8[%c32, %c0_125], %504 {strides = array<i32>} : memref<36x128xf32, #tpu.memory_space<vmem>>, vector<4x128xf32>,
    %c0_126 = arith.constant 0 : index
    %c0_127 = arith.constant 0 : index
    %506 = vector.load %arg6[%c0_126, %c0_127] : memref<8x36xf32, #tpu.memory_space<vmem>>, vector<8x36xf32>
    %c0_128 = arith.constant 0 : index
    %c0_129 = arith.constant 0 : index
    %507 = vector.load %arg8[%c0_128, %c0_129] : memref<36x128xf32, #tpu.memory_space<vmem>>, vector<36x128xf32>
    %cst_130 = arith.constant dense<0.000000e+00> : vector<8x128xf32>
    %508 = tpu.matmul %506, %507, %cst_130 {dimension_numbers = #tpu.dot_dimension_numbers<[1], [0], [0], [1], [0, 0, 1, 1], [], []>} : vector<8x36xf32>, vector<36x128xf32>, vector<8x128xf32> -> vector<8x128xf32>
    %c0_131 = arith.constant 0 : index
    %c0_132 = arith.constant 0 : index
    %c0_133 = arith.constant 0 : index
    %509 = vector.load %arg7[%c0_131, %c0_132, %c0_133] : memref<1x8x128xf32, #tpu.memory_space<vmem>>, vector<1x8x128xf32>
    %510 = vector.shape_cast %509 : vector<1x8x128xf32> to vector<8x128xf32>
    %511 = vector.shape_cast %508 : vector<8x128xf32> to vector<1x8x128xf32>
    tpu.vector_store %arg7[%c0_131, %c0_132, %c0_133], %511 {strides = array<i32>} : memref<1x8x128xf32, #tpu.memory_space<vmem>>, vector<1x8x128xf32>,
    return
  }
  func.func @transform_0(%arg0: i32, %arg1: i32) -> (i32, i32, i32) {
    %c0_i32 = arith.constant 0 : i32
    %c0_i32_0 = arith.constant 0 : i32
    return %arg0, %c0_i32, %arg1 : i32, i32, i32
  }
  func.func @transform_1(%arg0: i32, %arg1: i32) -> (i32, i32, i32) {
    %c0_i32 = arith.constant 0 : i32
    %c0_i32_0 = arith.constant 0 : i32
    %c0_i32_1 = arith.constant 0 : i32
    return %arg0, %c0_i32, %c0_i32_0 : i32, i32, i32
  }
  func.func @transform_2(%arg0: i32, %arg1: i32) -> (i32, i32) {
    %c0_i32 = arith.constant 0 : i32
    %c0_i32_0 = arith.constant 0 : i32
    return %c0_i32, %arg1 : i32, i32
  }
  func.func @transform_3(%arg0: i32, %arg1: i32) -> (i32, i32) {
    %c0_i32 = arith.constant 0 : i32
    %c0_i32_0 = arith.constant 0 : i32
    %c0_i32_1 = arith.constant 0 : i32
    return %c0_i32, %c0_i32_0 : i32, i32
  }
  func.func @transform_4(%arg0: i32, %arg1: i32) -> (i32, i32) {
    %c0_i32 = arith.constant 0 : i32
    %c0_i32_0 = arith.constant 0 : i32
    %c0_i32_1 = arith.constant 0 : i32
    return %c0_i32, %c0_i32_0 : i32, i32
  }
  func.func @transform_5(%arg0: i32, %arg1: i32) -> (i32, i32, i32) {
    %c0_i32 = arith.constant 0 : i32
    %c0_i32_0 = arith.constant 0 : i32
    return %arg0, %c0_i32, %arg1 : i32, i32, i32
  }
}

</mosaic_0001>

<bundles_post_ra>
// kernel: tpu_custom_call.1
= control target key start
LH: loop header
LB: loop body
LE: loop exit
PB: predicated region body
PF: predicated region fallthrough
CT: control target
= control target key end

     0   :  { %s2995_s0 = inlined_call_operand.vmem [shape: f32[2,36,256], index: 0, kind: input, shape index: {}]   ;;  %s2996_s1 = inlined_call_operand.vmem [shape: f32[2,64,16], index: 1, kind: input, shape index: {}]   ;;  %s2997_s2 = inlined_call_operand.vmem [shape: f32[2,256], index: 2, kind: input, shape index: {}]   ;;  %s2998_s3 = inlined_call_operand.vmem [shape: f32[18,36], index: 3, kind: input, shape index: {}]   ;;  %s2999_s4 = inlined_call_operand.vmem [shape: f32[8,36], index: 4, kind: input, shape index: {}]   ;;  %s3000_s5 = inlined_call_operand.hbm [shape: f32[2,8,256], index: 5, kind: output, shape index: {}]  }
   0x1   :  { %3001 = sst [smem:[#allocation7_spill]] %s2995_s0 }
   0x2   :  { %3002 = sst [smem:[#allocation8_spill]] %s2996_s1 }
   0x3   :  { %10 = vsyncpa [#allocation5], 0 }
   0x4   :  { %12 = vsyncpa [#allocation5 + $0x1], 0  ;;  %s2031_s18 = smov 0   ;;  %s2033_s19 = smov 0  }
   0x5   :  { %s2035_s20 = smov 0   ;;  %s2037_s21 = smov 0  }
   0x6   :  { %s2039_s22 = smov 0   ;;  %s2041_s23 = smov 0  }
   0x7   :  { %s2043_s24 = smov 0   ;;  %s2045_s25 = smov 0  }
   0x8 LB: > { %s1705_s26 = sadd.s32 4294967295, %s1999_s25   ;;  %s1706_s27 = sadd.s32 4294967294, %s1999_s25   ;;  %s1999_s25 = sphi %s2045_s25, %s18_s25   ;;  %s1995_s24 = sphi %s2043_s24, %s3080_s24   ;;  %s1991_s23 = sphi %s2041_s23, %s3079_s23   ;;  %s1987_s22 = sphi %s2039_s22, %s3078_s22   ;;  %s1983_s21 = sphi %s2037_s21, %s3077_s21   ;;  %s1979_s20 = sphi %s2035_s20, %s3076_s20   ;;  %s1975_s19 = sphi %s2033_s19, %s3075_s19   ;;  %s1971_s18 = sphi %s2031_s18, %s3074_s18  }
   0x9   : > { %s27_s28 = sadd.s32 1, %s1991_s23  ;;  %s30_s29 = sadd.s32 1, %s1995_s24 }
   0xa   : > { %p28_p0 = scmp.ge.s32.totalorder %s27_s28, 2  ;;  %p46_p1 = scmp.ne.s32.totalorder %s1979_s20, %s1975_s19 }
   0xb   : > { %p47_p2 = scmp.eq.s32.totalorder %s1999_s25, 0  ;;  %p172_p5 = scmp.eq.s32.totalorder %s1705_s26, 3 }
   0xc   : > { %s3082_s28 = smov (%p28_p0, %s27_s28), 0  ;;  %s3084_s29 = smov (!%p28_p0, %s30_s29), %s1995_s24 }
   0xd   : > { %s35_s30 = ssub.s32 %s1991_s23, %s3082_s28  ;;  %p2083_p3 = por %p47_p2, %p46_p1 }
   0xe   : > { %p32_p4 = scmp.ge.s32.totalorder %s3084_s29, 2  ;;  %p177_p6 = scmp.ne.s32.totalorder %s1975_s19, %s1971_s18 }
   0xf   : > { %p178_p7 = scmp.eq.s32.totalorder %s1706_s27, 3  ;;  %p2091_p8 = por %p172_p5, %p46_p1 }
  0x10   : > { %s3086_s29 = smov (%p32_p4, %s3084_s29), 0  ;;  %s39_s11 = sadd.s32 1, %s1979_s20 }
  0x11   : > { %p2095_p9 = por %p178_p7, %p177_p6  ;;  %s34_s9 = ssub.s32 %s1995_s24, %s3086_s29 }
  0x12   : > { %s36_s10 = sor.u32 %s35_s30, %s34_s9  ;;  %p1708_p11 = scmp.ge.s32.totalorder %s1999_s25, 4 }
  0x13   : > { %p37_p10 = scmp.eq.s32.totalorder %s36_s10, 0 }
  0x14   : > { %200 = sbr.rel (%p1708_p11) target bundleno = 39 (0x27), region = 24 }
  0x15   : > { %s2103_s12 = scalar_select %p37_p10, %s1979_s20, %s39_s11  }
  0x19   : > { %203 = sbr.rel (!%p2083_p3) target bundleno = 39 (0x27), region = 28  ;;  %s205_s13 = sand.u32 (%p2083_p3), 1, %s1979_s20  }
  0x1a   : > { %s1802_s14 = smul.u32 (%p2083_p3), 10, %s1995_s24  ;;  %s3006_s0 = sld [smem:[#allocation7_spill]] (%p2083_p3) }
  0x1b   : > { %s1801_s15 = smul.u32 (%p2083_p3), 40, %s205_s13 }
  0x1c   : > { %s209_s16 = sadd.s32 (%p2083_p3), %s1991_s23, %s1802_s14 }
  0x1d   : > { %s1709_s17 = sshll.u32 (%p2083_p3), %s209_s16, 3  ;;  %s207_s9 = scalar_lea.vmem (%p2083_p3), [#allocation3], %s1801_s15 }
  0x20   : > { %s211_s30 = scalar_lea.vmem %s3006_s0, %s1709_s17 }
  0x21   : > { %v248_v0 = vld [vmem:[%s211_s30] sm:$0xff]  ;;  %v250_v1 = vld [vmem:[%s211_s30 + $0x10] sm:$0xff] }
  0x22   : > { %v252_v2 = vld [vmem:[%s211_s30 + $0x20] sm:$0xff]  ;;  %249 = vst [vmem:[%s207_s9] sm:$0xff] %v248_v0  ;;  %v254_v3 = vld [vmem:[%s211_s30 + $0x30] sm:$0xff] }
  0x23   : > { %251 = vst [vmem:[%s207_s9 + $0x8] sm:$0xff] %v250_v1  ;;  %v256_v4 = vld [vmem:[%s211_s30 + $0x40] sm:$0xff] }
  0x24   : > { %253 = vst [vmem:[%s207_s9 + $0x10] sm:$0xff] %v252_v2 }
  0x25   : > { %255 = vst [vmem:[%s207_s9 + $0x18] sm:$0xff] %v254_v3 }
  0x26   : > { %257 = vst [vmem:[%s207_s9 + $0x20] sm:$0xff] %v256_v4 }
  0x27 PF: > { %p1710_p12 = scmp.ge.s32.totalorder %s1999_s25, 1  ;;  %p277_p13 = scmp.lt.s32.totalorder %s1999_s25, 5 }
  0x29   : > { %p278_p0 = pnand %p1710_p12, %p277_p13 }
  0x2a   : > { %s2117_s6 = sand.u32 (!%p278_p0), 1, %s1975_s19   ;;  %p325_p1 = scmp.lt.s32.totalorder (!%p278_p0), %s1983_s21, 1 }
  0x2b   : > { %281 = sbr.rel (%p278_p0) target bundleno = 653 (0x28d), region = 74  ;;  %p320_p2 = scmp.lt.s32.totalorder (!%p278_p0), %s1987_s22, 1 }
  0x2c   : > { %s1803_s10 = smul.u32 (!%p278_p0), 40, %s2117_s6  ;;  %s3011_s1 = sld [smem:[#allocation8_spill]] (!%p278_p0) }
  0x2d   : > { %s1584_s26 = scalar_lea.sflag (!%p278_p0), [#allocation5], %s2117_s6 }
  0x2e   : > { %s286_s11 = scalar_lea.vmem (!%p278_p0), [#allocation3], %s1803_s10  ;;  %s1711_s10 = sshll.u32 (!%p278_p0), %s2117_s6, 3 }
  0x2f   : > { %s319_s16 = scalar_lea.vmem (!%p278_p0), [#allocation4], %s1711_s10 }
  0x30   : > { %vm356_vm0 = vcmask 1043456   ;;  %v333_v5 = vld [vmem:[%s286_s11 + $0x20] sm:$0xf]  ;;  %v332_v6 = vld [vmem:[%s286_s11 + $0x18] sm:$0xff]  ;;  %v331_v7 = vld [vmem:[%s286_s11 + $0x10] sm:$0xff]  ;;  %vm346_vm1 = vcmask 293888   ;;  %v386_v15 = vlaneseq }
  0x31   : > { %1715 = vmatpush.msk.msra.mxu0 %vm356_vm0, %v333_v5  ;;  %v330_v8 = vld [vmem:[%s286_s11 + $0x8] sm:$0xff]  ;;  %v329_v9 = vld [vmem:[%s286_s11] sm:$0xff]  ;;  %v343_v10 = vld [vmem:[%s2998_s3] sm:$0xff]  ;;  %s326_s27 = scalar_select %p325_p1, %s1983_s21, 1  ;;  %vm424_vm3 = vcmask 130048  }
  0x32   : > { %v344_v11 = vld [vmem:[%s2998_s3 + $0x8] sm:$0xff]  ;;  %v345_v12 = vld [vmem:[%s2998_s3 + $0x10] sm:$0x3]  ;;  %v2147_v22 = vshrl.u32 %v386_v15, 7  ;;  %s321_s13 = scalar_select %p320_p2, %s1987_s22, 1 }
  0x33   : > { %372 = vmatpush.msra.mxu0 %v332_v6  ;;  %s1714_s30 = sshll.u32 %s326_s27, 1 }
  0x34   : > { %s328_s11 = scalar_lea.vmem %s2997_s2, %s1714_s30  ;;  %v2167_v32 = vadd.s32 8, %v2147_v22  ;;  %s1798_s14 = sshll.u32 %s321_s13, 6 }
  0x35   : > { %373 = vmatpush.msra.mxu0 %v331_v7  ;;  %v2138_v13 = vld [vmem:[%s328_s11] sm:$0x3]  ;;  %s2200_s17 = scalar_lea.vmem %s3011_s1, %s1798_s14  ;;  %s1794_s30 = sshll.u32 %s1987_s22, 1 }
  0x36   : > { %v2141_v14 = vadd.f32 -1.0, %v2138_v13  ;;  %v2145_v21 = vadd.f32 1.0, %v2138_v13  ;;  %v2212_v2 = vld [vmem:[%s2200_s17] sm:$0xff]  ;;  %s1594_s9 = sadd.s32 %s1983_s21, %s1794_s30  ;;  %s1925_s30 = scalar_lea.hbm %s3000_s5, 32 }
  0x37   : > { %374 = vmatpush.msra.mxu0 %v330_v8  ;;  %v2215_v3 = vld [vmem:[%s2200_s17 + $0x20] sm:$0xff]  ;;  %s1795_s11 = sshll.u32 %s1594_s9, 3 }
  0x38   : > { %s1596_s15 = scalar_lea.hbm %s3000_s5, %s1795_s11 }
  0x39   : > { %375 = vmatpush.msra.mxu0 %v329_v9  ;;  %s1600_s0 = sshll.u32 %s1596_s15, 4  ;;  %s1601_s0 = int_to_ptr.hbm [resolvable:$true] %s1600_s0 }
  0x3a   : > { %1716 = vmatmul.msk.f32.vlgmr.msra.gmra.mxu0 %vm346_vm1, %v343_v10  ;;  %s1919_s27 = sshra.s32 %s1601_s0, 4  ;;  %s1920_s27 = int_to_ptr.hbm [resolvable:$true] %s1919_s27 }
  0x3b   : > { %s1921_s1 = scalar_lea.hbm %s1920_s27, 8  ;;  %p1926_p6 = scmp.lt.s32.totalorder %s1920_s27, %s3000_s5 }
  0x3c   : > { %p1922_p3 = scmp.ne.s32.totalorder %s1920_s27, %s1921_s1  ;;  %p1927_p7 = scmp.lt.s32.totalorder %s1925_s30, %s1921_s1 }
  0x3e   : > { %p1923_p4 = pnand %p1922_p3, %p2091_p8  ;;  %p1928_p10 = por %p1927_p7, %p1926_p6 }
  0x40   : > { %p1924_p5 = pneg %p1923_p4 }
  0x42   : > { %1717 = vmatmul.msk.f32.gmra.mxu0 %vm346_vm1, %v344_v11  ;;  %p1929_p11 = pnand %p1928_p10, %p1924_p5 }
  0x4a   : > { %1718 = vmatmul.msk.f32.gmra.mxu0 %vm346_vm1, %v345_v12 }
  0xb7   : > { %v377_v16 = vpop.f32.mrf.mxu0 }
  0xb8   : > { %v390_v17 = vadd.f32 %v2141_v14, %v377_v16  ;;  %v539_v18 = vrot.slane %v377_v16, 2  ;;  %v668_v19 = vrot.slane %v377_v16, 4  ;;  %v797_v20 = vrot.slane %v377_v16, 6 }
  0xba   : > { %v391_v23 = vfloor.f32 %v390_v17  ;;  %v2150_v24 = vadd.f32 %v539_v18, %v2141_v14  ;;  %v2153_v25 = vadd.f32 %v668_v19, %v2141_v14  ;;  %v2157_v26 = vadd.f32 %v797_v20, %v2138_v13 }
  0xbb   : > { %v800_v27 = vadd.f32 %v797_v20, %v2141_v14  ;;  %v543_v28 = vadd.f32 %v539_v18, %v2138_v13  ;;  %v672_v31 = vadd.f32 %v2145_v21, %v668_v19 }
  0xbc   : > { %v2161_v29 = vsub.f32 %v390_v17, %v391_v23  ;;  %v2163_v30 = vcvt.f32.s32 %v391_v23 }
  0xbd   : > { %v545_v33 = vfloor.f32 %v543_v28  ;;  %v802_v36 = vfloor.f32 %v800_v27  ;;  %v674_v40 = vfloor.f32 %v672_v31 }
  0xbe   : > { %v394_v34 = vperm.slane %v2163_v30, 1  ;;  %v397_v35 = vsub.f32 1.0, %v2161_v29  ;;  %v2173_v37 = vadd.s32 1, %v2163_v30  ;;  %v405_v42 = vperm.slane %v2161_v29, 1 }
  0xbf   : > { %v547_v44 = vsub.f32 %v543_v28, %v545_v33  ;;  %v1809_v47 = vcvt.f32.s32 %v545_v33  ;;  %v2193_v48 = vsub.f32 %v800_v27, %v802_v36  ;;  %v1817_v58 = vcvt.f32.s32 %v802_v36 }
  0xc0   : > { %vm2176_vm2 = vcmp.eq.s32.totalorder %v2167_v32, %v394_v34  ;;  %v398_v39 = vperm.slane %v397_v35, 1  ;;  %v402_v41 = vperm.slane %v2173_v37, 1  ;;  %vm2185_vm4 = vcmp.eq.s32.totalorder %v2147_v22, %v394_v34 }
  0xc1   : > { %v553_v49 = vsub.f32 1.0, %v547_v44  ;;  %v561_v50 = vperm.slane %v547_v44, 1  ;;  %v550_v53 = vperm.slane %v1809_v47, 1  ;;  %v557_v54 = vadd.s32 1, %v1809_v47 }
  0xc2   : > { %v400_v45 = vsel %vm2176_vm2, %v398_v39, 0.0  ;;  %v399_v46 = vsel %vm2185_vm4, %v398_v39, 0.0  ;;  %vm404_vm5 = vcmp.eq.s32.totalorder %v2167_v32, %v402_v41  ;;  %vm403_vm6 = vcmp.eq.s32.totalorder %v2147_v22, %v402_v41  ;;  %v380_v39 = vpop.f32.mrf.mxu0 }
  0xc3   : > { %v407_v51 = vsel %vm404_vm5, %v405_v42, 0.0  ;;  %v406_v52 = vsel %vm403_vm6, %v405_v42, 0.0  ;;  %v554_v57 = vperm.slane %v553_v49, 1  ;;  %vm2203_vm7 = vcmp.eq.s32.totalorder %v2167_v32, %v550_v53 }
  0xc4   : > { %v409_v55 = vadd.f32 %v407_v51, %v400_v45  ;;  %v408_v56 = vadd.f32 %v406_v52, %v399_v46  ;;  %v558_v60 = vperm.slane %v557_v54, 1  ;;  %v810_v61 = vsub.f32 1.0, %v2193_v48  ;;  %v2251_v46 = vld [vmem:[%s2200_s17 + $0x8] sm:$0xff] }
  0xc5   : > { %v818_v62 = vperm.slane %v2193_v48, 1  ;;  %v556_v63 = vsel %vm2203_vm7, %v554_v57, 0.0  ;;  %v807_v0 = vperm.slane %v1817_v58, 1  ;;  %v814_v1 = vadd.s32 1, %v1817_v58  ;;  %v2257_v52 = vld [vmem:[%s2200_s17 + $0x28] sm:$0xff] }
  0xc6   : > { %463 = vmatpush.msra.mxu1 %v409_v55  ;;  %1799 = vmatpush.msra.mxu3 %v409_v55  ;;  %v676_v4 = vsub.f32 %v672_v31, %v674_v40  ;;  %vm560_vm8 = vcmp.eq.s32.totalorder %v2167_v32, %v558_v60  ;;  %v811_v5 = vperm.slane %v810_v61, 1  ;;  %v1813_v6 = vcvt.f32.s32 %v674_v40 }
  0xc7   : > { %vm2219_vm9 = vcmp.eq.s32.totalorder %v2147_v22, %v550_v53  ;;  %v563_v8 = vsel %vm560_vm8, %v561_v50, 0.0  ;;  %vm2224_vm10 = vcmp.eq.s32.totalorder %v2167_v32, %v807_v0  ;;  %v815_v10 = vperm.slane %v814_v1, 1 }
  0xc8   : > { %464 = vmatpush.msra.mxu1 %v408_v56  ;;  %1800 = vmatpush.msra.mxu3 %v408_v56  ;;  %v682_v11 = vsub.f32 1.0, %v676_v4  ;;  %v565_v12 = vadd.f32 %v563_v8, %v556_v63  ;;  %v813_v15 = vsel %vm2224_vm10, %v811_v5, 0.0  ;;  %v679_v16 = vperm.slane %v1813_v6, 1  ;;  %v2298_v8 = vld [vmem:[%s2200_s17 + $0x30] sm:$0xff] }
  0xc9   : > { %1719 = vmatmul.msk.f32.vlgmr.msra.gmra.mxu1 %vm424_vm3, %v2212_v2  ;;  %1723 = vmatmul.msk.f32.vlgmr.msra.gmra.mxu3 %vm424_vm3, %v2215_v3  ;;  %v686_v17 = vadd.s32 1, %v1813_v6  ;;  %vm817_vm11 = vcmp.eq.s32.totalorder %v2167_v32, %v815_v10  ;;  %v690_v19 = vperm.slane %v676_v4, 1  ;;  %v555_v20 = vsel %vm2219_vm9, %v554_v57, 0.0 }
  0xca   : > { %v683_v18 = vperm.slane %v682_v11, 1  ;;  %596 = vmatpush.msra.mxu2 %v565_v12  ;;  %v820_v23 = vsel %vm817_vm11, %v818_v62, 0.0  ;;  %vm2238_vm12 = vcmp.eq.s32.totalorder %v2167_v32, %v679_v16  ;;  %vm559_vm13 = vcmp.eq.s32.totalorder %v2147_v22, %v558_v60 }
  0xcb   : > { %v687_v28 = vperm.slane %v686_v17, 1  ;;  %v822_v31 = vadd.f32 %v820_v23, %v813_v15  ;;  %v562_v34 = vsel %vm559_vm13, %v561_v50, 0.0  ;;  %vm808_vm14 = vcmp.eq.s32.totalorder %v2147_v22, %v807_v0 }
  0xcc   : > { %v685_v33 = vsel %vm2238_vm12, %v683_v18, 0.0  ;;  %v564_v36 = vadd.f32 %v562_v34, %v555_v20  ;;  %v812_v38 = vsel %vm808_vm14, %v811_v5, 0.0  ;;  %vm816_vm2 = vcmp.eq.s32.totalorder %v2147_v22, %v815_v10 }
  0xcd   : > { %vm689_vm15 = vcmp.eq.s32.totalorder %v2167_v32, %v687_v28  ;;  %853 = vmatpush.msrb.mxu0 %v822_v31  ;;  %v819_v41 = vsel %vm816_vm2, %v818_v62, 0.0  ;;  %vm680_vm4 = vcmp.eq.s32.totalorder %v2147_v22, %v679_v16  ;;  %vm688_vm5 = vcmp.eq.s32.totalorder %v2147_v22, %v687_v28 }
  0xce   : > { %v692_v40 = vsel %vm689_vm15, %v690_v19, 0.0  ;;  %597 = vmatpush.msra.mxu2 %v564_v36  ;;  %v821_v43 = vadd.f32 %v819_v41, %v812_v38  ;;  %v684_v44 = vsel %vm680_vm4, %v683_v18, 0.0  ;;  %v691_v45 = vsel %vm688_vm5, %v690_v19, 0.0 }
  0xcf   : > { %v694_v42 = vadd.f32 %v692_v40, %v685_v33  ;;  %1727 = vmatmul.msk.f32.vlgmr.msra.gmra.mxu2 %vm424_vm3, %v2212_v2  ;;  %v925_v47 = vadd.f32 %v380_v39, %v2138_v13  ;;  %v1046_v48 = vrot.slane %v380_v39, 2  ;;  %v1174_v49 = vrot.slane %v380_v39, 4  ;;  %v383_v40 = vpop.f32.mrf.mxu0 }
  0xd0   : > { %854 = vmatpush.msrb.mxu0 %v821_v43  ;;  %v693_v50 = vadd.f32 %v691_v45, %v684_v44  ;;  %v1302_v51 = vrot.slane %v380_v39, 6  ;;  %v2283_v1 = vperm.slane %v397_v35, 0  ;;  %v416_v4 = vperm.slane %v2173_v37, 0 }
  0xd1   : > { %725 = vmatpush.msrb.mxu3 %v694_v42  ;;  %1743 = vmatmul.msk.f32.vlgmr.msrb.gmra.mxu0 %vm424_vm3, %v2212_v2  ;;  %v926_v53 = vfloor.f32 %v925_v47  ;;  %v2262_v54 = vadd.f32 %v1046_v48, %v2138_v13  ;;  %v1049_v55 = vadd.f32 %v1046_v48, %v2145_v21  ;;  %v2266_v56 = vadd.f32 %v1174_v49, %v2145_v21  ;;  %v2346_v42 = vld [vmem:[%s2200_s17 + $0x18] sm:$0xff] }
  0xd2   : > { %1720 = vmatmul.msk.f32.gmra.mxu1 %vm424_vm3, %v2251_v46  ;;  %v1177_v57 = vadd.f32 %v1174_v49, %v2141_v14  ;;  %v2272_v58 = vadd.f32 %v1302_v51, %v2145_v21  ;;  %v1305_v59 = vadd.f32 %v1302_v51, %v2138_v13  ;;  %1724 = vmatmul.msk.f32.gmra.mxu3 %vm424_vm3, %v2257_v52  ;;  %v2286_v14 = vld [vmem:[%s2200_s17 + $0x10] sm:$0xff]  ;;  %v410_v13 = vperm.slane %v2163_v30, 0 }
  0xd3   : > { %726 = vmatpush.msrb.mxu3 %v693_v50  ;;  %v2277_v60 = vsub.f32 %v925_v47, %v926_v53  ;;  %v2279_v61 = vcvt.f32.s32 %v926_v53  ;;  %v1051_v0 = vfloor.f32 %v1049_v55  ;;  %v419_v6 = vperm.slane %v2161_v29, 0  ;;  %v2368_v53 = vld [vmem:[%s2200_s17 + $0x38] sm:$0xff]  ;;  %s1598_s17 = sshll.u32 %s319_s16, 4  ;;  %s1599_s17 = int_to_ptr.vmem [resolvable:$true] %s1598_s17 }
  0xd4   : > { %v1179_v62 = vfloor.f32 %v1177_v57  ;;  %v1307_v63 = vfloor.f32 %v1305_v59  ;;  %vm2341_vm11 = vcmp.eq.s32.totalorder %v2147_v22, %v410_v13  ;;  %vm2352_vm12 = vcmp.eq.s32.totalorder %v2147_v22, %v416_v4 }
  0xd5   : > { %v929_v35 = vperm.slane %v2279_v61, 1  ;;  %v932_v9 = vsub.f32 1.0, %v2277_v60  ;;  %v2303_v10 = vadd.s32 1, %v2279_v61  ;;  %v940_v12 = vperm.slane %v2277_v60, 1 }
  0xd6   : > { %v2289_v5 = vsub.f32 %v1177_v57, %v1179_v62  ;;  %v2295_v7 = vcvt.f32.s32 %v1179_v62  ;;  %v2305_v11 = vsub.f32 %v1305_v59, %v1307_v63  ;;  %v2312_v15 = vsub.f32 %v1049_v55, %v1051_v0 }
  0xd7   : > { %1728 = vmatmul.msk.f32.gmra.mxu2 %vm424_vm3, %v2251_v46  ;;  %v1823_v16 = vcvt.f32.s32 %v1051_v0  ;;  %v2314_v17 = vcvt.f32.s32 %v1307_v63  ;;  %vm2317_vm6 = vcmp.eq.s32.totalorder %v2167_v32, %v929_v35  ;;  %v933_v19 = vperm.slane %v932_v9, 1 }
  0xd8   : > { %v937_v20 = vperm.slane %v2303_v10, 1  ;;  %vm930_vm7 = vcmp.eq.s32.totalorder %v2147_v22, %v929_v35  ;;  %v1059_v27 = vsub.f32 1.0, %v2312_v15  ;;  %v1184_v28 = vperm.slane %v2295_v7, 1 }
  0xd9   : > { %1744 = vmatmul.msk.f32.gmra.mxu0 %vm424_vm3, %v2251_v46  ;;  %v1056_v23 = vperm.slane %v1823_v16, 1  ;;  %v935_v31 = vsel %vm2317_vm6, %v933_v19, 0.0  ;;  %v934_v33 = vsel %vm930_vm7, %v933_v19, 0.0  ;;  %v1063_v44 = vadd.s32 1, %v1823_v16 }
  0xda   : > { %1721 = vmatmul.msk.f32.gmra.mxu1 %vm424_vm3, %v2286_v14  ;;  %1725 = vmatmul.msk.f32.gmra.mxu3 %vm424_vm3, %v2298_v8  ;;  %vm939_vm8 = vcmp.eq.s32.totalorder %v2167_v32, %v937_v20  ;;  %vm938_vm9 = vcmp.eq.s32.totalorder %v2147_v22, %v937_v20  ;;  %v1060_v39 = vperm.slane %v1059_v27, 1  ;;  %v1067_v45 = vperm.slane %v2312_v15, 1 }
  0xdb   : > { %v942_v34 = vsel %vm939_vm8, %v940_v12, 0.0  ;;  %v941_v36 = vsel %vm938_vm9, %v940_v12, 0.0  ;;  %vm2334_vm10 = vcmp.eq.s32.totalorder %v2167_v32, %v1056_v23  ;;  %vm2361_vm13 = vcmp.eq.s32.totalorder %v2167_v32, %v1184_v28 }
  0xdc   : > { %v944_v41 = vadd.f32 %v942_v34, %v935_v31  ;;  %v943_v43 = vadd.f32 %v941_v36, %v934_v33  ;;  %v1062_v48 = vsel %vm2334_vm10, %v1060_v39, 0.0  ;;  %v1187_v50 = vsub.f32 1.0, %v2289_v5 }
  0xdd   : > { %v1191_v51 = vadd.s32 1, %v2295_v7  ;;  %v1064_v55 = vperm.slane %v1063_v44, 1  ;;  %v1195_v57 = vperm.slane %v2289_v5, 1  ;;  %v1312_v59 = vperm.slane %v2314_v17, 1 }
  0xde   : > { %973 = vmatpush.msrb.mxu1 %v944_v41  ;;  %v1315_v62 = vsub.f32 1.0, %v2305_v11  ;;  %v1188_v63 = vperm.slane %v1187_v50, 1  ;;  %v1319_v7 = vadd.s32 1, %v2314_v17  ;;  %v1323_v35 = vperm.slane %v2305_v11, 1 }
  0xdf   : > { %1729 = vmatmul.msk.f32.gmra.mxu2 %vm424_vm3, %v2286_v14  ;;  %v1192_v0 = vperm.slane %v1191_v51, 1  ;;  %vm1066_vm14 = vcmp.eq.s32.totalorder %v2167_v32, %v1064_v55  ;;  %vm2381_vm15 = vcmp.eq.s32.totalorder %v2167_v32, %v1312_v59  ;;  %vm2386_vm2 = vcmp.eq.s32.totalorder %v2147_v22, %v1056_v23 }
  0xe0   : > { %974 = vmatpush.msrb.mxu1 %v943_v43  ;;  %v1316_v12 = vperm.slane %v1315_v62, 1  ;;  %v1069_v16 = vsel %vm1066_vm14, %v1067_v45, 0.0  ;;  %v1190_v11 = vsel %vm2361_vm13, %v1188_v63, 0.0  ;;  %v1320_v17 = vperm.slane %v1319_v7, 1 }
  0xe1   : > { %1745 = vmatmul.msk.f32.gmra.mxu0 %vm424_vm3, %v2286_v14  ;;  %vm1194_vm4 = vcmp.eq.s32.totalorder %v2167_v32, %v1192_v0  ;;  %v1071_v18 = vadd.f32 %v1069_v16, %v1062_v48  ;;  %v1061_v23 = vsel %vm2386_vm2, %v1060_v39, 0.0  ;;  %vm1065_vm6 = vcmp.eq.s32.totalorder %v2147_v22, %v1064_v55 }
  0xe2   : > { %1722 = vmatmul.msk.f32.gmra.mxu1 %vm424_vm3, %v2346_v42  ;;  %1726 = vmatmul.msk.f32.gmra.mxu3 %vm424_vm3, %v2368_v53  ;;  %v1197_v19 = vsel %vm1194_vm4, %v1195_v57, 0.0  ;;  %v1318_v20 = vsel %vm2381_vm15, %v1316_v12, 0.0  ;;  %vm1322_vm5 = vcmp.eq.s32.totalorder %v2167_v32, %v1320_v17  ;;  %vm1185_vm7 = vcmp.eq.s32.totalorder %v2147_v22, %v1184_v28 }
  0xe3   : > { %v1199_v27 = vadd.f32 %v1197_v19, %v1190_v11  ;;  %1102 = vmatpush.msrb.mxu2 %v1071_v18  ;;  %v1325_v31 = vsel %vm1322_vm5, %v1323_v35, 0.0  ;;  %v1068_v33 = vsel %vm1065_vm6, %v1067_v45, 0.0  ;;  %v1189_v34 = vsel %vm1185_vm7, %v1188_v63, 0.0 }
  0xe4   : > { %vm1193_vm8 = vcmp.eq.s32.totalorder %v2147_v22, %v1192_v0  ;;  %v1327_v36 = vadd.f32 %v1325_v31, %v1318_v20  ;;  %v1070_v38 = vadd.f32 %v1068_v33, %v1061_v23  ;;  %vm1313_vm9 = vcmp.eq.s32.totalorder %v2147_v22, %v1312_v59 }
  0xe5   : > { %1230 = vmatpush.msra.mxu3 %v1199_v27  ;;  %v1196_v39 = vsel %vm1193_vm8, %v1195_v57, 0.0  ;;  %v1317_v43 = vsel %vm1313_vm9, %v1316_v12, 0.0  ;;  %vm1321_vm10 = vcmp.eq.s32.totalorder %v2147_v22, %v1320_v17  ;;  %v414_v28 = vsel %vm2341_vm11, %v2283_v1, 0.0 }
  0xe6   : > { %v1198_v41 = vadd.f32 %v1196_v39, %v1189_v34  ;;  %1358 = vmatpush.msra.mxu0 %v1327_v36  ;;  %1103 = vmatpush.msrb.mxu2 %v1070_v38  ;;  %v1324_v44 = vsel %vm1321_vm10, %v1323_v35, 0.0  ;;  %v420_v45 = vsel %vm2352_vm12, %v419_v6, 0.0  ;;  %vm412_vm11 = vcmp.eq.s32.totalorder %v2167_v32, %v410_v13 }
  0xe7   : > { %1730 = vmatmul.msk.f32.gmra.mxu2 %vm424_vm3, %v2346_v42  ;;  %v1326_v48 = vadd.f32 %v1324_v44, %v1317_v43  ;;  %v2416_v49 = vadd.f32 %v420_v45, %v414_v28  ;;  %vm418_vm12 = vcmp.eq.s32.totalorder %v2167_v32, %v416_v4  ;;  %v1430_v47 = vadd.f32 %v2145_v21, %v383_v40 }
  0xe8   : > { %1231 = vmatpush.msra.mxu3 %v1198_v41  ;;  %v415_v50 = vsel %vm412_vm11, %v2283_v1, 0.0  ;;  %v421_v51 = vsel %vm418_vm12, %v419_v6, 0.0  ;;  %v951_v37 = vperm.slane %v2303_v10, 0  ;;  %v948_v6 = vperm.slane %v932_v9, 0 }
  0xe9   : > { %1746 = vmatmul.msk.f32.gmra.mxu0 %vm424_vm3, %v2346_v42  ;;  %v1431_v55 = vfloor.f32 %v1430_v47  ;;  %v2432_v57 = vadd.f32 %v421_v51, %v415_v50  ;;  %v945_v10 = vperm.slane %v2279_v61, 0  ;;  %v954_v9 = vperm.slane %v2277_v60, 0 }
  0xea   : > { %1735 = vmatmul.msk.f32.vlgmr.msrb.gmra.mxu3 %vm424_vm3, %v2212_v2  ;;  %1751 = vmatmul.msk.f32.vlgmr.msrb.gmra.mxu1 %vm424_vm3, %v2212_v2  ;;  %vm952_vm15 = vcmp.eq.s32.totalorder %v2147_v22, %v951_v37  ;;  %vm953_vm7 = vcmp.eq.s32.totalorder %v2167_v32, %v951_v37  ;;  %v544_v37 = vfloor.f32 %v2150_v24 }
  0xeb   : > { %1359 = vmatpush.msra.mxu0 %v1326_v48  ;;  %v2436_v30 = vsub.f32 %v1430_v47, %v1431_v55  ;;  %v2438_v13 = vcvt.f32.s32 %v1431_v55  ;;  %vm946_vm2 = vcmp.eq.s32.totalorder %v2147_v22, %v945_v10  ;;  %v955_v61 = vsel %vm952_vm15, %v954_v9, 0.0 }
  0xec   : > { %v949_v5 = vsel %vm946_vm2, %v948_v6, 0.0  ;;  %vm947_vm4 = vcmp.eq.s32.totalorder %v2167_v32, %v945_v10  ;;  %v956_v17 = vsel %vm953_vm7, %v954_v9, 0.0  ;;  %vm530_vm2 = vcmask 1041409  }
  0xed   : > { %v1441_v21 = vadd.s32 1, %v2438_v13  ;;  %v1459_v29 = vperm.slane %v2436_v30, 0  ;;  %v1437_v1 = vsub.f32 1.0, %v2436_v30  ;;  %v1434_v59 = vperm.slane %v2438_v13, 1 }
  0xee   : > { %v1445_v35 = vperm.slane %v2436_v30, 1  ;;  %v2470_v12 = vadd.f32 %v955_v61, %v949_v5  ;;  %v950_v60 = vsel %vm947_vm4, %v948_v6, 0.0  ;;  %v1450_v27 = vperm.slane %v2438_v13, 0 }
  0xef   : > { %1731 = vmatmul.msk.f32.gmra.mxu2 %vm424_vm3, %v2215_v3  ;;  %v1456_v4 = vperm.slane %v1441_v21, 0  ;;  %v1442_v62 = vperm.slane %v1441_v21, 1  ;;  %v1438_v7 = vperm.slane %v1437_v1, 1  ;;  %vm1436_vm5 = vcmp.eq.s32.totalorder %v2167_v32, %v1434_v59 }
  0xf0   : > { %v2480_v18 = vadd.f32 %v956_v17, %v950_v60  ;;  %vm1435_vm8 = vcmp.eq.s32.totalorder %v2147_v22, %v1434_v59  ;;  %vm1451_vm10 = vcmp.eq.s32.totalorder %v2147_v22, %v1450_v27  ;;  %vm1452_vm11 = vcmp.eq.s32.totalorder %v2167_v32, %v1450_v27 }
  0xf1   : > { %1747 = vmatmul.msk.f32.gmra.mxu0 %vm424_vm3, %v2215_v3  ;;  %vm1457_vm13 = vcmp.eq.s32.totalorder %v2147_v22, %v1456_v4  ;;  %vm1458_vm14 = vcmp.eq.s32.totalorder %v2167_v32, %v1456_v4  ;;  %vm1444_vm6 = vcmp.eq.s32.totalorder %v2167_v32, %v1442_v62  ;;  %v1440_v15 = vsel %vm1436_vm5, %v1438_v7, 0.0 }
  0xf2   : > { %1736 = vmatmul.msk.f32.gmra.mxu3 %vm424_vm3, %v2251_v46  ;;  %1752 = vmatmul.msk.f32.gmra.mxu1 %vm424_vm3, %v2251_v46  ;;  %v2458_v63 = vsel %vm1457_vm13, %v1459_v29, 0.0  ;;  %v2460_v0 = vsel %vm1458_vm14, %v1459_v29, 0.0  ;;  %v1447_v16 = vsel %vm1444_vm6, %v1445_v35, 0.0  ;;  %vm1443_vm9 = vcmp.eq.s32.totalorder %v2147_v22, %v1442_v62 }
  0xf3   : > { %v1449_v11 = vadd.f32 %v1447_v16, %v1440_v15  ;;  %v1439_v19 = vsel %vm1435_vm8, %v1438_v7, 0.0  ;;  %v1446_v20 = vsel %vm1443_vm9, %v1445_v35, 0.0  ;;  %v2611_v7 = vsub.f32 %v2150_v24, %v544_v37 }
  0xf4   : > { %v1448_v23 = vadd.f32 %v1446_v20, %v1439_v19  ;;  %vm532_vm4 = vcmask 1042434   ;;  %vm534_vm8 = vcmask 1043459  }
  0xf5   : > { %1478 = vmatpush.msra.mxu1 %v1449_v11 }
  0xf7   : > { %1732 = vmatmul.msk.f32.gmra.mxu2 %vm424_vm3, %v2257_v52  ;;  %1479 = vmatpush.msra.mxu1 %v1448_v23 }
  0xf9   : > { %1748 = vmatmul.msk.f32.gmra.mxu0 %vm424_vm3, %v2257_v52 }
  0xfa   : > { %1737 = vmatmul.msk.f32.gmra.mxu3 %vm424_vm3, %v2286_v14  ;;  %1753 = vmatmul.msk.f32.gmra.mxu1 %vm424_vm3, %v2286_v14 }
  0xff   : > { %1733 = vmatmul.msk.f32.gmra.mxu2 %vm424_vm3, %v2298_v8 }
 0x101   : > { %1749 = vmatmul.msk.f32.gmra.mxu0 %vm424_vm3, %v2298_v8 }
 0x102   : > { %1738 = vmatmul.msk.f32.gmra.mxu3 %vm424_vm3, %v2346_v42  ;;  %1754 = vmatmul.msk.f32.gmra.mxu1 %vm424_vm3, %v2346_v42 }
 0x107   : > { %1734 = vmatmul.msk.f32.gmra.mxu2 %vm424_vm3, %v2368_v53 }
 0x109   : > { %1750 = vmatmul.msk.f32.gmra.mxu0 %vm424_vm3, %v2368_v53 }
 0x10a   : > { %1739 = vmatmul.msk.f32.gmra.mxu3 %vm424_vm3, %v2215_v3  ;;  %1755 = vmatmul.msk.f32.gmra.mxu1 %vm424_vm3, %v2215_v3 }
 0x10f   : > { %1759 = vmatmul.msk.f32.vlgmr.msrb.gmra.mxu2 %vm424_vm3, %v2212_v2 }
 0x111   : > { %1775 = vmatmul.msk.f32.vlgmr.msra.gmra.mxu0 %vm424_vm3, %v2212_v2 }
 0x112   : > { %1740 = vmatmul.msk.f32.gmra.mxu3 %vm424_vm3, %v2257_v52  ;;  %1756 = vmatmul.msk.f32.gmra.mxu1 %vm424_vm3, %v2257_v52 }
 0x117   : > { %1760 = vmatmul.msk.f32.gmra.mxu2 %vm424_vm3, %v2251_v46 }
 0x119   : > { %1776 = vmatmul.msk.f32.gmra.mxu0 %vm424_vm3, %v2251_v46 }
 0x11a   : > { %1741 = vmatmul.msk.f32.gmra.mxu3 %vm424_vm3, %v2298_v8  ;;  %1757 = vmatmul.msk.f32.gmra.mxu1 %vm424_vm3, %v2298_v8 }
 0x11f   : > { %1761 = vmatmul.msk.f32.gmra.mxu2 %vm424_vm3, %v2286_v14 }
 0x121   : > { %1777 = vmatmul.msk.f32.gmra.mxu0 %vm424_vm3, %v2286_v14 }
 0x122   : > { %1742 = vmatmul.msk.f32.gmra.mxu3 %vm424_vm3, %v2368_v53  ;;  %1758 = vmatmul.msk.f32.gmra.mxu1 %vm424_vm3, %v2368_v53 }
 0x127   : > { %1762 = vmatmul.msk.f32.gmra.mxu2 %vm424_vm3, %v2346_v42 }
 0x129   : > { %1778 = vmatmul.msk.f32.gmra.mxu0 %vm424_vm3, %v2346_v42 }
 0x12a   : > { %1767 = vmatmul.msk.f32.vlgmr.msra.gmra.mxu3 %vm424_vm3, %v2212_v2  ;;  %1783 = vmatmul.msk.f32.vlgmr.msra.gmra.mxu1 %vm424_vm3, %v2212_v2  ;;  %v1453_v2 = vperm.slane %v1437_v1, 0 }
 0x12c   : > { %v1455_v31 = vsel %vm1452_vm11, %v1453_v2, 0.0 }
 0x12d   : > { %v2557_v34 = vadd.f32 %v2460_v0, %v1455_v31  ;;  %v1807_v0 = vcvt.f32.s32 %v544_v37 }
 0x12f   : > { %1763 = vmatmul.msk.f32.gmra.mxu2 %vm424_vm3, %v2215_v3  ;;  %v573_v11 = vadd.s32 1, %v1807_v0  ;;  %v566_v27 = vperm.slane %v1807_v0, 0 }
 0x131   : > { %1779 = vmatmul.msk.f32.gmra.mxu0 %vm424_vm3, %v2215_v3  ;;  %vm2624_vm12 = vcmp.eq.s32.totalorder %v2147_v22, %v566_v27  ;;  %vm2650_vm6 = vcmp.eq.s32.totalorder %v2167_v32, %v566_v27 }
 0x132   : > { %1768 = vmatmul.msk.f32.gmra.mxu3 %vm424_vm3, %v2251_v46  ;;  %1784 = vmatmul.msk.f32.gmra.mxu1 %vm424_vm3, %v2251_v46  ;;  %v1454_v46 = vsel %vm1451_vm10, %v1453_v2, 0.0 }
 0x133   : > { %v2554_v33 = vadd.f32 %v2458_v63, %v1454_v46 }
 0x137   : > { %1764 = vmatmul.msk.f32.gmra.mxu2 %vm424_vm3, %v2257_v52 }
 0x139   : > { %1780 = vmatmul.msk.f32.gmra.mxu0 %vm424_vm3, %v2257_v52 }
 0x13a   : > { %1769 = vmatmul.msk.f32.gmra.mxu3 %vm424_vm3, %v2286_v14  ;;  %1785 = vmatmul.msk.f32.gmra.mxu1 %vm424_vm3, %v2286_v14 }
 0x13f   : > { %1765 = vmatmul.msk.f32.gmra.mxu2 %vm424_vm3, %v2298_v8 }
 0x141   : > { %1781 = vmatmul.msk.f32.gmra.mxu0 %vm424_vm3, %v2298_v8 }
 0x142   : > { %1770 = vmatmul.msk.f32.gmra.mxu3 %vm424_vm3, %v2346_v42  ;;  %1786 = vmatmul.msk.f32.gmra.mxu1 %vm424_vm3, %v2346_v42 }
 0x146   : > { %v466_v14 = vpop.f32.mrf.mxu1 }
 0x147   : > { %1766 = vmatmul.msk.f32.gmra.mxu2 %vm424_vm3, %v2368_v53  ;;  %v490_v41 = vmul.f32 %v466_v14, %v2416_v49 }
 0x149   : > { %1782 = vmatmul.msk.f32.gmra.mxu0 %vm424_vm3, %v2368_v53 }
 0x14a   : > { %1771 = vmatmul.msk.f32.gmra.mxu3 %vm424_vm3, %v2215_v3  ;;  %1787 = vmatmul.msk.f32.gmra.mxu1 %vm424_vm3, %v2215_v3 }
 0x14c   : > { %v478_v36 = vpop.f32.mrf.mxu3 }
 0x14d   : > { %v494_v45 = vmul.f32 %v478_v36, %v2416_v49 }
 0x14e   : > { %v2575_v38 = vpop.f32.mrf.mxu0 }
 0x14f   : > { %v469_v39 = vpop.f32.mrf.mxu1 }
 0x150   : > { %v491_v42 = vmul.f32 %v469_v39, %v2432_v57 }
 0x152   : > { %v498_v43 = vadd.f32 %v491_v42, %v490_v41  ;;  %v2579_v28 = vpop.f32.mrf.mxu2  ;;  %1772 = vmatmul.msk.f32.gmra.mxu3 %vm424_vm3, %v2257_v52  ;;  %1788 = vmatmul.msk.f32.gmra.mxu1 %vm424_vm3, %v2257_v52  ;;  %v801_v52 = vfloor.f32 %v2157_v26 }
 0x154   : > { %v499_v50 = vrot.slane %v498_v43, 4  ;;  %v1815_v59 = vcvt.f32.s32 %v801_v52  ;;  %v2602_v62 = vsub.f32 %v2157_v26, %v801_v52 }
 0x155   : > { %v481_v3 = vpop.f32.mrf.mxu3 }
 0x156   : > { %v2585_v44 = vpop.f32.mrf.mxu0  ;;  %v495_v48 = vmul.f32 %v481_v3, %v2432_v57  ;;  %v500_v30 = vadd.f32 %v499_v50, %v498_v43  ;;  %v830_v5 = vadd.s32 1, %v1815_v59  ;;  %v826_v26 = vsub.f32 1.0, %v2602_v62 }
 0x157   : > { %v472_v40 = vpop.f32.mrf.mxu1  ;;  %v823_v61 = vperm.slane %v1815_v59, 0  ;;  %v834_v36 = vperm.slane %v2602_v62, 0 }
 0x158   : > { %v512_v47 = vadd.f32 %v495_v48, %v494_v45  ;;  %v492_v4 = vmul.f32 %v472_v40, %v2416_v49  ;;  %v501_v10 = vrot.slane %v500_v30, 2  ;;  %v831_v46 = vperm.slane %v830_v5, 0 }
 0x159   : > { %v827_v14 = vperm.slane %v826_v26, 0  ;;  %vm2629_vm13 = vcmp.eq.s32.totalorder %v2167_v32, %v823_v61 }
 0x15a   : > { %v2589_v51 = vpop.f32.mrf.mxu2  ;;  %v513_v55 = vrot.slane %v512_v47, 4  ;;  %1773 = vmatmul.msk.f32.gmra.mxu3 %vm424_vm3, %v2298_v8  ;;  %1789 = vmatmul.msk.f32.gmra.mxu1 %vm424_vm3, %v2298_v8  ;;  %v502_v60 = vadd.f32 %v501_v10, %v500_v30  ;;  %vm2634_vm14 = vcmp.eq.s32.totalorder %v2147_v22, %v831_v46  ;;  %vm833_vm15 = vcmp.eq.s32.totalorder %v2167_v32, %v831_v46 }
 0x15b   : > { %v577_v30 = vperm.slane %v2611_v7, 0  ;;  %v836_v62 = vsel %vm833_vm15, %v834_v36, 0.0 }
 0x15c   : > { %v514_v29 = vadd.f32 %v513_v55, %v512_v47  ;;  %v503_v39 = vrot.slane %v502_v60, 1 }
 0x15d   : > { %v484_v21 = vpop.f32.mrf.mxu3 }
 0x15e   : > { %v2596_v13 = vpop.f32.mrf.mxu0  ;;  %v515_v9 = vrot.slane %v514_v29, 2  ;;  %v496_v19 = vmul.f32 %v484_v21, %v2416_v49  ;;  %v574_v49 = vperm.slane %v573_v11, 0  ;;  %v504_v52 = vadd.f32 %v503_v39, %v502_v60 }
 0x15f   : > { %v475_v1 = vpop.f32.mrf.mxu1 }
 0x160   : > { %v493_v6 = vmul.f32 %v475_v1, %v2432_v57  ;;  %v516_v17 = vadd.f32 %v515_v9, %v514_v29  ;;  %vm2643_vm5 = vcmp.eq.s32.totalorder %v2147_v22, %v574_v49  ;;  %v829_v1 = vsel %vm2629_vm13, %v827_v14, 0.0 }
 0x161   : > { %vm576_vm7 = vcmp.eq.s32.totalorder %v2167_v32, %v574_v49 }
 0x162   : > { %v505_v8 = vadd.f32 %v493_v6, %v492_v4  ;;  %v2604_v63 = vpop.f32.mrf.mxu2  ;;  %1774 = vmatmul.msk.f32.gmra.mxu3 %vm424_vm3, %v2368_v53  ;;  %1790 = vmatmul.msk.f32.gmra.mxu1 %vm424_vm3, %v2368_v53  ;;  %v569_v53 = vsub.f32 1.0, %v2611_v7  ;;  %vm2619_vm3 = vcmp.eq.s32.totalorder %v2147_v22, %v823_v61  ;;  %v835_v61 = vsel %vm2634_vm14, %v834_v36, 0.0 }
 0x163   : > { %v828_v26 = vsel %vm2619_vm3, %v827_v14, 0.0  ;;  %v673_v14 = vfloor.f32 %v2153_v25 }
 0x164   : > { %v506_v35 = vrot.slane %v505_v8, 4  ;;  %v570_v48 = vperm.slane %v569_v53, 0  ;;  %v2669_v53 = vadd.f32 %v836_v62, %v829_v1 }
 0x165   : > { %v487_v16 = vpop.f32.mrf.mxu3 }
 0x166   : > { %v507_v15 = vadd.f32 %v506_v35, %v505_v8  ;;  %v865_v20 = vpop.f32.mrf.mxu0  ;;  %v497_v23 = vmul.f32 %v487_v16, %v2432_v57  ;;  %v517_v57 = vrot.slane %v516_v17, 1  ;;  %v579_v16 = vsel %vm576_vm7, %v577_v30, 0.0 }
 0x167   : > { %v976_v2 = vpop.f32.mrf.mxu1  ;;  %v883_v46 = vmul.f32 %v865_v20, %v2669_v53  ;;  %v881_v39 = vmul.f32 %v2585_v44, %v2669_v53 }
 0x168   : > { %v508_v24 = vrot.slane %v507_v15, 2  ;;  %v519_v31 = vadd.f32 %v497_v23, %v496_v19  ;;  %v518_v4 = vadd.f32 %v517_v57, %v516_v17  ;;  %v1000_v35 = vmul.f32 %v976_v2, %v2470_v12 }
 0x169   : > { %v571_v19 = vsel %vm2624_vm12, %v570_v48, 0.0  ;;  %v578_v23 = vsel %vm2643_vm5, %v577_v30, 0.0 }
 0x16a   : > { %v509_v41 = vadd.f32 %v508_v24, %v507_v15  ;;  %v608_v42 = vpop.f32.mrf.mxu2  ;;  %v520_v3 = vrot.slane %v519_v31, 4  ;;  %v572_v15 = vsel %vm2650_vm6, %v570_v48, 0.0  ;;  %v2671_v24 = vadd.f32 %v835_v61, %v828_v26 }
 0x16b   : > { %v2673_v2 = vadd.f32 %v579_v16, %v572_v15  ;;  %v2679_v36 = vadd.f32 %v578_v23, %v571_v19 }
 0x16c   : > { %v510_v47 = vrot.slane %v509_v41, 1  ;;  %v521_v55 = vadd.f32 %v520_v3, %v519_v31  ;;  %v882_v57 = vmul.f32 %v2596_v13, %v2671_v24  ;;  %v880_v48 = vmul.f32 %v2575_v38, %v2671_v24 }
 0x16d   : > { %v2640_v37 = vpop.f32.mrf.mxu3  ;;  %v624_v49 = vmul.f32 %v2589_v51, %v2673_v2  ;;  %v626_v20 = vmul.f32 %v608_v42, %v2673_v2  ;;  %v623_v40 = vmul.f32 %v2579_v28, %v2679_v36  ;;  %v625_v51 = vmul.f32 %v2604_v63, %v2679_v36 }
 0x16e   : > { %v511_v21 = vadd.f32 %v510_v47, %v509_v41  ;;  %v522_v6 = vrot.slane %v521_v55, 2  ;;  %v868_v59 = vpop.f32.mrf.mxu0  ;;  %v895_v47 = vadd.f32 %v883_v46, %v882_v57  ;;  %v888_v42 = vadd.f32 %v881_v39, %v880_v48 }
 0x16f   : > { %v979_v0 = vpop.f32.mrf.mxu1  ;;  %v884_v44 = vmul.f32 %v868_v59, %v2671_v24  ;;  %v631_v38 = vadd.f32 %v624_v49, %v623_v40  ;;  %v638_v29 = vadd.f32 %v626_v20, %v625_v51 }
 0x170   : > { %v531_v8 = vsel %vm530_vm2, %v511_v21, %v504_v52  ;;  %v523_v9 = vadd.f32 %v522_v6, %v521_v55  ;;  %v1001_v5 = vmul.f32 %v979_v0, %v2480_v18  ;;  %v2698_v55 = vsub.f32 %v2153_v25, %v673_v14 }
 0x171   : > { %v533_v7 = vsel %vm532_vm4, %v518_v4, %v531_v8  ;;  %v1811_v21 = vcvt.f32.s32 %v673_v14  ;;  %v896_v4 = vrot.slane %v895_v47, 4  ;;  %v889_v62 = vrot.slane %v888_v42, 4 }
 0x172   : > { %v611_v60 = vpop.f32.mrf.mxu2  ;;  %v524_v11 = vrot.slane %v523_v9, 1  ;;  %v1008_v17 = vadd.f32 %v1001_v5, %v1000_v35  ;;  %v698_v63 = vsub.f32 1.0, %v2698_v55  ;;  %v632_v8 = vrot.slane %v631_v38, 4 }
 0x173   : > { %v627_v1 = vmul.f32 %v611_v60, %v2679_v36  ;;  %v639_v0 = vrot.slane %v638_v29, 4  ;;  %v702_v35 = vadd.s32 1, %v1811_v21  ;;  %v897_v61 = vadd.f32 %v896_v4, %v895_v47 }
 0x174   : > { %v525_v27 = vadd.f32 %v524_v11, %v523_v9  ;;  %v1009_v50 = vrot.slane %v1008_v17, 4  ;;  %v695_v9 = vperm.slane %v1811_v21, 0  ;;  %v890_v11 = vadd.f32 %v889_v62, %v888_v42 }
 0x175   : > { %v2676_v31 = vpop.f32.mrf.mxu3  ;;  %v640_v46 = vadd.f32 %v639_v0, %v638_v29  ;;  %v703_v39 = vperm.slane %v702_v35, 0  ;;  %v706_v49 = vperm.slane %v2698_v55, 0 }
 0x176   : > { %v535_v41 = vsel %vm534_vm8, %v525_v27, %v533_v7  ;;  %v871_v43 = vpop.f32.mrf.mxu0  ;;  %v1010_v28 = vadd.f32 %v1009_v50, %v1008_v17  ;;  %v2707_v17 = vperm.slane %v698_v63, 0  ;;  %v633_v27 = vadd.f32 %v632_v8, %v631_v38 }
 0x177   : > { %537 = vst [vmem:[#allocation2] sm:$0xf] %v535_v41  ;;  %v885_v3 = vmul.f32 %v871_v43, %v2669_v53  ;;  %v982_v45 = vpop.f32.mrf.mxu1  ;;  %vm2710_vm9 = vcmp.eq.s32.totalorder %v2147_v22, %v695_v9  ;;  %v898_v43 = vrot.slane %v897_v61, 2  ;;  %v641_v50 = vrot.slane %v640_v46, 2 }
 0x178   : > { %v1002_v5 = vmul.f32 %v982_v45, %v2470_v12  ;;  %v1011_v60 = vrot.slane %v1010_v28, 2  ;;  %v891_v45 = vrot.slane %v890_v11, 2  ;;  %v700_v48 = vsel %vm2710_vm9, %v2707_v17, 0.0 }
 0x179   : > { %v902_v52 = vadd.f32 %v885_v3, %v884_v44  ;;  %v634_v47 = vrot.slane %v633_v27, 2  ;;  %vm2723_vm10 = vcmp.eq.s32.totalorder %v2147_v22, %v703_v39  ;;  %vm2728_vm11 = vcmp.eq.s32.totalorder %v2167_v32, %v695_v9 }
 0x17a   : > { %v614_v13 = vpop.f32.mrf.mxu2  ;;  %v1012_v57 = vadd.f32 %v1011_v60, %v1010_v28  ;;  %vm2733_vm3 = vcmp.eq.s32.totalorder %v2167_v32, %v703_v39  ;;  %v642_v8 = vadd.f32 %v641_v50, %v640_v46  ;;  %v707_v9 = vsel %vm2723_vm10, %v706_v49, 0.0 }
 0x17b   : > { %v628_v30 = vmul.f32 %v614_v13, %v2673_v2  ;;  %v903_v10 = vrot.slane %v902_v52, 4 }
 0x17c   : > { %v1013_v29 = vrot.slane %v1012_v57, 1  ;;  %v643_v14 = vrot.slane %v642_v8, 1 }
 0x17d   : > { %v645_v6 = vadd.f32 %v628_v30, %v627_v1  ;;  %v2702_v59 = vpop.f32.mrf.mxu3  ;;  %v904_v19 = vadd.f32 %v903_v10, %v902_v52  ;;  %v892_v10 = vadd.f32 %v891_v45, %v890_v11 }
 0x17e   : > { %v874_v25 = vpop.f32.mrf.mxu0 }
 0x17f   : > { %v985_v7 = vpop.f32.mrf.mxu1  ;;  %v646_v15 = vrot.slane %v645_v6, 4  ;;  %v905_v44 = vrot.slane %v904_v19, 2  ;;  %v886_v13 = vmul.f32 %v874_v25, %v2671_v24  ;;  %v899_v24 = vadd.f32 %v898_v43, %v897_v61 }
 0x180   : > { %v1003_v26 = vmul.f32 %v985_v7, %v2480_v18  ;;  %v635_v25 = vadd.f32 %v634_v47, %v633_v27  ;;  %v701_v7 = vsel %vm2728_vm11, %v2707_v17, 0.0  ;;  %v893_v27 = vrot.slane %v892_v10, 1 }
 0x181   : > { %v647_v20 = vadd.f32 %v646_v15, %v645_v6  ;;  %v906_v28 = vadd.f32 %v905_v44, %v904_v19  ;;  %v1014_v15 = vadd.f32 %v1013_v29, %v1012_v57  ;;  %v2755_v47 = vadd.f32 %v707_v9, %v700_v48 }
 0x182   : > { %v617_v16 = vpop.f32.mrf.mxu2  ;;  %v1015_v23 = vadd.f32 %v1003_v26, %v1002_v5  ;;  %v900_v26 = vrot.slane %v899_v24, 1  ;;  %v636_v46 = vrot.slane %v635_v25, 1  ;;  %v894_v55 = vadd.f32 %v893_v27, %v892_v10 }
 0x183   : > { %v629_v6 = vmul.f32 %v617_v16, %v2679_v36  ;;  %v708_v36 = vsel %vm2733_vm3, %v706_v49, 0.0  ;;  %v907_v16 = vrot.slane %v906_v28, 1  ;;  %v754_v48 = vmul.f32 %v2702_v59, %v2755_v47 }
 0x184   : > { %v1016_v41 = vrot.slane %v1015_v23, 4  ;;  %v2751_v44 = vadd.f32 %v708_v36, %v701_v7  ;;  %v637_v30 = vadd.f32 %v636_v46, %v635_v25  ;;  %v752_v59 = vmul.f32 %v2640_v37, %v2755_v47 }
 0x185   : > { %v2715_v3 = vpop.f32.mrf.mxu3  ;;  %v908_v50 = vadd.f32 %v907_v16, %v906_v28 }
 0x186   : > { %v1017_v40 = vadd.f32 %v1016_v41, %v1015_v23  ;;  %v877_v51 = vpop.f32.mrf.mxu0 }
 0x187   : > { %v887_v42 = vmul.f32 %v877_v51, %v2669_v53  ;;  %v988_v52 = vpop.f32.mrf.mxu1  ;;  %v648_v53 = vrot.slane %v647_v20, 2 }
 0x188   : > { %v1018_v38 = vrot.slane %v1017_v40, 2  ;;  %v1004_v45 = vmul.f32 %v988_v52, %v2470_v12  ;;  %v755_v52 = vmul.f32 %v2715_v3, %v2751_v44 }
 0x189   : > { %v909_v1 = vadd.f32 %v887_v42, %v886_v13  ;;  %v649_v61 = vadd.f32 %v648_v53, %v647_v20  ;;  %v901_v20 = vadd.f32 %v900_v26, %v899_v24  ;;  %v753_v24 = vmul.f32 %v2676_v31, %v2751_v44 }
 0x18a   : > { %v620_v4 = vpop.f32.mrf.mxu2  ;;  %v1019_v63 = vadd.f32 %v1018_v38, %v1017_v40  ;;  %v644_v38 = vadd.f32 %v643_v14, %v642_v8  ;;  %v767_v8 = vadd.f32 %v755_v52, %v754_v48 }
 0x18b   : > { %v630_v62 = vmul.f32 %v620_v4, %v2673_v2  ;;  %v910_v0 = vrot.slane %v909_v1, 4  ;;  %v650_v57 = vrot.slane %v649_v61, 1 }
 0x18c   : > { %v1020_v35 = vrot.slane %v1019_v63, 1  ;;  %v663_v7 = vsel %vm530_vm2, %v644_v38, %v637_v30 }
 0x18d   : > { %v652_v5 = vadd.f32 %v630_v62, %v629_v6  ;;  %v911_v60 = vadd.f32 %v910_v0, %v909_v1  ;;  %v740_v2 = vpop.f32.mrf.mxu3  ;;  %v920_v1 = vsel %vm530_vm2, %v901_v20, %v894_v55  ;;  %v651_v4 = vadd.f32 %v650_v57, %v649_v61 }
 0x18e   : > { %v1021_v11 = vadd.f32 %v1020_v35, %v1019_v63  ;;  %v2746_v23 = vpop.f32.mrf.mxu0  ;;  %v921_v63 = vsel %vm532_vm4, %v908_v50, %v920_v1  ;;  %v756_v0 = vmul.f32 %v740_v2, %v2755_v47  ;;  %v1306_v2 = vfloor.f32 %v2272_v58 }
 0x18f   : > { %v653_v19 = vrot.slane %v652_v5, 4  ;;  %v912_v39 = vrot.slane %v911_v60, 2  ;;  %v991_v17 = vpop.f32.mrf.mxu1  ;;  %v664_v26 = vsel %vm532_vm4, %v651_v4, %v663_v7 }
 0x190   : > { %v1040_v41 = vsel %vm530_vm2, %v1021_v11, %v1014_v15  ;;  %v1005_v49 = vmul.f32 %v991_v17, %v2480_v18  ;;  %v768_v11 = vrot.slane %v767_v8, 4  ;;  %v1050_v17 = vfloor.f32 %v2262_v54 }
 0x191   : > { %v654_v43 = vadd.f32 %v653_v19, %v652_v5  ;;  %v913_v40 = vadd.f32 %v912_v39, %v911_v60  ;;  %v760_v60 = vadd.f32 %v753_v24, %v752_v59  ;;  %v2785_v50 = vsub.f32 %v2272_v58, %v1306_v2 }
 0x192   : > { %v2753_v51 = vpop.f32.mrf.mxu2  ;;  %v1022_v42 = vadd.f32 %v1005_v49, %v1004_v45  ;;  %v1829_v49 = vcvt.f32.s32 %v1306_v2  ;;  %v1821_v52 = vcvt.f32.s32 %v1050_v17 }
 0x193   : > { %v655_v13 = vrot.slane %v654_v43, 2  ;;  %v914_v21 = vrot.slane %v913_v40, 1  ;;  %v761_v37 = vrot.slane %v760_v60, 4 }
 0x194   : > { %v1023_v53 = vrot.slane %v1022_v42, 4  ;;  %v1335_v24 = vadd.s32 1, %v1829_v49 }
 0x195   : > { %v656_v29 = vadd.f32 %v655_v13, %v654_v43  ;;  %v915_v28 = vadd.f32 %v914_v21, %v913_v40  ;;  %v743_v6 = vpop.f32.mrf.mxu3  ;;  %v769_v43 = vadd.f32 %v768_v11, %v767_v8  ;;  %v762_v55 = vadd.f32 %v761_v37, %v760_v60 }
 0x196   : > { %v1024_v10 = vadd.f32 %v1023_v53, %v1022_v42  ;;  %v2765_v25 = vpop.f32.mrf.mxu0  ;;  %v757_v3 = vmul.f32 %v743_v6, %v2751_v44  ;;  %v2790_v21 = vsub.f32 %v2262_v54, %v1050_v17 }
 0x197   : > { %v657_v62 = vrot.slane %v656_v29, 1  ;;  %v922_v31 = vsel %vm534_vm8, %v915_v28, %v921_v63  ;;  %v994_v9 = vpop.f32.mrf.mxu1  ;;  %v770_v38 = vrot.slane %v769_v43, 2  ;;  %v763_v1 = vrot.slane %v762_v55, 2 }
 0x198   : > { %924 = vst [vmem:[#allocation2 + $0xc] sm:$0xf] %v922_v31  ;;  %v1025_v5 = vrot.slane %v1024_v10, 2  ;;  %v774_v36 = vadd.f32 %v757_v3, %v756_v0  ;;  %v1006_v57 = vmul.f32 %v994_v9, %v2470_v12  ;;  %v1328_v12 = vperm.slane %v1829_v49, 0 }
 0x199   : > { %v658_v35 = vadd.f32 %v657_v62, %v656_v29  ;;  %v1075_v54 = vsub.f32 1.0, %v2790_v21  ;;  %v771_v6 = vadd.f32 %v770_v38, %v769_v43  ;;  %v1079_v63 = vadd.s32 1, %v1821_v52 }
 0x19a   : > { %v2774_v61 = vpop.f32.mrf.mxu2  ;;  %v1026_v16 = vadd.f32 %v1025_v5, %v1024_v10  ;;  %v775_v27 = vrot.slane %v774_v36, 4  ;;  %v1336_v10 = vperm.slane %v1335_v24, 0  ;;  %v1339_v0 = vperm.slane %v2785_v50, 0 }
 0x19b   : > { %v665_v15 = vsel %vm534_vm8, %v658_v35, %v664_v26  ;;  %v1072_v9 = vperm.slane %v1821_v52, 0  ;;  %vm2800_vm12 = vcmp.eq.s32.totalorder %v2167_v32, %v1328_v12  ;;  %v772_v26 = vrot.slane %v771_v6, 1 }
 0x19c   : > { %667 = vst [vmem:[#allocation2 + $0x4] sm:$0xf] %v665_v15  ;;  %v1027_v19 = vrot.slane %v1026_v16, 1  ;;  %v776_v13 = vadd.f32 %v775_v27, %v774_v36  ;;  %vm2805_vm13 = vcmp.eq.s32.totalorder %v2147_v22, %v1328_v12  ;;  %v1076_v60 = vperm.slane %v1075_v54, 0 }
 0x19d   : > { %v746_v46 = vpop.f32.mrf.mxu3  ;;  %v1080_v15 = vperm.slane %v1079_v63, 0  ;;  %vm1338_vm14 = vcmp.eq.s32.totalorder %v2167_v32, %v1336_v10  ;;  %vm2812_vm15 = vcmp.eq.s32.totalorder %v2147_v22, %v1336_v10  ;;  %vm2817_vm5 = vcmp.eq.s32.totalorder %v2147_v22, %v1072_v9 }
 0x19e   : > { %v1028_v14 = vadd.f32 %v1027_v19, %v1026_v16  ;;  %v2778_v39 = vpop.f32.mrf.mxu0  ;;  %v777_v53 = vrot.slane %v776_v13, 2  ;;  %v758_v58 = vmul.f32 %v746_v46, %v2755_v47  ;;  %v764_v47 = vadd.f32 %v763_v1, %v762_v55 }
 0x19f   : > { %v997_v45 = vpop.f32.mrf.mxu1  ;;  %v1083_v16 = vperm.slane %v2790_v21, 0  ;;  %vm2826_vm6 = vcmp.eq.s32.totalorder %v2167_v32, %v1072_v9  ;;  %vm2831_vm7 = vcmp.eq.s32.totalorder %v2147_v22, %v1080_v15  ;;  %vm1082_vm9 = vcmp.eq.s32.totalorder %v2167_v32, %v1080_v15 }
 0x1a0   : > { %v1041_v20 = vsel %vm532_vm4, %v1028_v14, %v1040_v41  ;;  %v1007_v40 = vmul.f32 %v997_v45, %v2480_v18  ;;  %v1331_v41 = vsub.f32 1.0, %v2785_v50  ;;  %v778_v7 = vadd.f32 %v777_v53, %v776_v13 }
 0x1a1   : > { %v765_v17 = vrot.slane %v764_v47, 1  ;;  %v1341_v13 = vsel %vm1338_vm14, %v1339_v0, 0.0  ;;  %v1078_v12 = vsel %vm2826_vm6, %v1076_v60, 0.0  ;;  %v1085_v1 = vsel %vm1082_vm9, %v1083_v16, 0.0 }
 0x1a2   : > { %v2787_v42 = vpop.f32.mrf.mxu2  ;;  %v1029_v30 = vadd.f32 %v1007_v40, %v1006_v57  ;;  %v1332_v8 = vperm.slane %v1331_v41, 0  ;;  %v779_v37 = vrot.slane %v778_v7, 1  ;;  %v773_v40 = vadd.f32 %v772_v26, %v771_v6 }
 0x1a4   : > { %v1030_v29 = vrot.slane %v1029_v30, 4  ;;  %v1334_v46 = vsel %vm2800_vm12, %v1332_v8, 0.0  ;;  %v1333_v24 = vsel %vm2805_vm13, %v1332_v8, 0.0  ;;  %v780_v41 = vadd.f32 %v779_v37, %v778_v7 }
 0x1a5   : > { %v749_v18 = vpop.f32.mrf.mxu3  ;;  %v2849_v54 = vadd.f32 %v1341_v13, %v1334_v46 }
 0x1a6   : > { %v1031_v4 = vadd.f32 %v1030_v29, %v1029_v30  ;;  %v2794_v48 = vpop.f32.mrf.mxu0  ;;  %v759_v28 = vmul.f32 %v749_v18, %v2751_v44  ;;  %v1340_v29 = vsel %vm2812_vm15, %v1339_v0, 0.0  ;;  %v766_v18 = vadd.f32 %v765_v17, %v764_v47 }
 0x1a7   : > { %v1481_v62 = vpop.f32.mrf.mxu1  ;;  %v1178_v0 = vfloor.f32 %v2266_v56  ;;  %v1386_v7 = vmul.f32 %v2765_v25, %v2849_v54 }
 0x1a8   : > { %v1032_v3 = vrot.slane %v1031_v4, 2  ;;  %v781_v31 = vadd.f32 %v759_v28, %v758_v58  ;;  %v1505_v52 = vmul.f32 %v1481_v62, %v2554_v33  ;;  %v1084_v28 = vsel %vm2831_vm7, %v1083_v16, 0.0 }
 0x1a9   : > { %v792_v6 = vsel %vm530_vm2, %v773_v40, %v766_v18  ;;  %v2852_v62 = vadd.f32 %v1340_v29, %v1333_v24  ;;  %v2882_v27 = vsub.f32 %v2266_v56, %v1178_v0  ;;  %v1825_v17 = vcvt.f32.s32 %v1178_v0 }
 0x1aa   : > { %v1114_v59 = vpop.f32.mrf.mxu2  ;;  %v1033_v44 = vadd.f32 %v1032_v3, %v1031_v4  ;;  %v782_v5 = vrot.slane %v781_v31, 4  ;;  %v1077_v4 = vsel %vm2817_vm5, %v1076_v60, 0.0  ;;  %v793_v10 = vsel %vm532_vm4, %v780_v41, %v792_v6 }
 0x1ab   : > { %v2855_v3 = vadd.f32 %v1085_v1, %v1078_v12  ;;  %v2862_v9 = vadd.f32 %v1084_v28, %v1077_v4  ;;  %v1385_v60 = vmul.f32 %v2746_v23, %v2852_v62  ;;  %v1203_v50 = vsub.f32 1.0, %v2882_v27 }
 0x1ac   : > { %v1034_v11 = vrot.slane %v1033_v44, 1  ;;  %v783_v2 = vadd.f32 %v782_v5, %v781_v31  ;;  %v1388_v31 = vmul.f32 %v2794_v48, %v2849_v54  ;;  %v1387_v5 = vmul.f32 %v2778_v39, %v2852_v62 }
 0x1ad   : > { %v2823_v14 = vpop.f32.mrf.mxu3  ;;  %v1132_v48 = vmul.f32 %v1114_v59, %v2855_v3  ;;  %v1129_v15 = vmul.f32 %v2753_v51, %v2862_v9  ;;  %v1200_v56 = vperm.slane %v1825_v17, 0  ;;  %v1204_v28 = vperm.slane %v1203_v50, 0 }
 0x1ae   : > { %v1035_v45 = vadd.f32 %v1034_v11, %v1033_v44  ;;  %v784_v49 = vrot.slane %v783_v2, 2  ;;  %v1373_v57 = vpop.f32.mrf.mxu0  ;;  %v1130_v44 = vmul.f32 %v2774_v61, %v2855_v3  ;;  %v1131_v61 = vmul.f32 %v2787_v42, %v2862_v9 }
 0x1af   : > { %v1484_v55 = vpop.f32.mrf.mxu1  ;;  %v1389_v25 = vmul.f32 %v1373_v57, %v2852_v62  ;;  %v1400_v16 = vadd.f32 %v1388_v31, %v1387_v5  ;;  %vm2891_vm10 = vcmp.eq.s32.totalorder %v2147_v22, %v1200_v56  ;;  %v1211_v31 = vperm.slane %v2882_v27, 0 }
 0x1b0   : > { %v1042_v30 = vsel %vm534_vm8, %v1035_v45, %v1041_v20  ;;  %v785_v21 = vadd.f32 %v784_v49, %v783_v2  ;;  %v1506_v38 = vmul.f32 %v1484_v55, %v2557_v34  ;;  %v1393_v2 = vadd.f32 %v1386_v7, %v1385_v60 }
 0x1b1   : > { %1044 = vst [vmem:[#allocation2 + $0x10] sm:$0xf] %v1042_v30  ;;  %v1137_v46 = vadd.f32 %v1130_v44, %v1129_v15  ;;  %v1144_v23 = vadd.f32 %v1132_v48, %v1131_v61  ;;  %v1401_v43 = vrot.slane %v1400_v16, 4  ;;  %vm2899_vm11 = vcmp.eq.s32.totalorder %v2167_v32, %v1200_v56 }
 0x1b2   : > { %v1117_v53 = vpop.f32.mrf.mxu2  ;;  %v786_v20 = vrot.slane %v785_v21, 1  ;;  %v1513_v58 = vadd.f32 %v1506_v38, %v1505_v52  ;;  %v1394_v42 = vrot.slane %v1393_v2, 4 }
 0x1b3   : > { %v1133_v37 = vmul.f32 %v1117_v53, %v2862_v9  ;;  %v1138_v13 = vrot.slane %v1137_v46, 4  ;;  %v1145_v55 = vrot.slane %v1144_v23, 4  ;;  %v1402_v24 = vadd.f32 %v1401_v43, %v1400_v16 }
 0x1b4   : > { %v787_v63 = vadd.f32 %v786_v20, %v785_v21  ;;  %v1514_v11 = vrot.slane %v1513_v58, 4  ;;  %v1207_v21 = vadd.s32 1, %v1825_v17  ;;  %v1395_v53 = vadd.f32 %v1394_v42, %v1393_v2 }
 0x1b5   : > { %v2859_v8 = vpop.f32.mrf.mxu3  ;;  %v1139_v20 = vadd.f32 %v1138_v13, %v1137_v46  ;;  %v1205_v16 = vsel %vm2891_vm10, %v1204_v28, 0.0  ;;  %v1206_v42 = vsel %vm2899_vm11, %v1204_v28, 0.0 }
 0x1b6   : > { %v794_v47 = vsel %vm534_vm8, %v787_v63, %v793_v10  ;;  %v1376_v35 = vpop.f32.mrf.mxu0  ;;  %v1515_v51 = vadd.f32 %v1514_v11, %v1513_v58  ;;  %v1146_v58 = vadd.f32 %v1145_v55, %v1144_v23  ;;  %v1208_v6 = vperm.slane %v1207_v21, 0 }
 0x1b7   : > { %796 = vst [vmem:[#allocation2 + $0x8] sm:$0xf] %v794_v47  ;;  %v1390_v26 = vmul.f32 %v1376_v35, %v2849_v54  ;;  %v1487_v36 = vpop.f32.mrf.mxu1  ;;  %v1403_v10 = vrot.slane %v1402_v24, 2  ;;  %v1396_v35 = vrot.slane %v1395_v53, 2 }
 0x1b8   : > { %v1507_v52 = vmul.f32 %v1487_v36, %v2554_v33  ;;  %v1516_v29 = vrot.slane %v1515_v51, 2  ;;  %v1140_v36 = vrot.slane %v1139_v20, 2  ;;  %v1147_v60 = vrot.slane %v1146_v58, 2 }
 0x1b9   : > { %v1407_v19 = vadd.f32 %v1390_v26, %v1389_v25  ;;  %vm2908_vm3 = vcmp.eq.s32.totalorder %v2147_v22, %v1208_v6  ;;  %vm2913_vm12 = vcmp.eq.s32.totalorder %v2167_v32, %v1208_v6  ;;  %v1397_v17 = vadd.f32 %v1396_v35, %v1395_v53 }
 0x1ba   : > { %v1120_v39 = vpop.f32.mrf.mxu2  ;;  %v1517_v0 = vadd.f32 %v1516_v29, %v1515_v51  ;;  %v1141_v43 = vadd.f32 %v1140_v36, %v1139_v20  ;;  %v1148_v51 = vadd.f32 %v1147_v60, %v1146_v58  ;;  %v1212_v32 = vsel %vm2908_vm3, %v1211_v31, 0.0 }
 0x1bb   : > { %v1134_v59 = vmul.f32 %v1120_v39, %v2855_v3  ;;  %v1408_v57 = vrot.slane %v1407_v19, 4  ;;  %v1213_v13 = vsel %vm2913_vm12, %v1211_v31, 0.0 }
 0x1bc   : > { %v1149_v29 = vrot.slane %v1148_v51, 1  ;;  %v1215_v4 = vadd.f32 %v1213_v13, %v1206_v42 }
 0x1bd   : > { %v1151_v45 = vadd.f32 %v1134_v59, %v1133_v37  ;;  %v2885_v49 = vpop.f32.mrf.mxu3  ;;  %v1409_v18 = vadd.f32 %v1408_v57, %v1407_v19  ;;  %v1404_v19 = vadd.f32 %v1403_v10, %v1402_v24  ;;  %v1518_v59 = vrot.slane %v1517_v0, 1 }
 0x1be   : > { %v1379_v40 = vpop.f32.mrf.mxu0  ;;  %v1142_v24 = vrot.slane %v1141_v43, 1 }
 0x1bf   : > { %v1490_v30 = vpop.f32.mrf.mxu1  ;;  %v1152_v41 = vrot.slane %v1151_v45, 4  ;;  %v1410_v44 = vrot.slane %v1409_v18, 2  ;;  %v1391_v25 = vmul.f32 %v1379_v40, %v2852_v62  ;;  %v1405_v50 = vrot.slane %v1404_v19, 1 }
 0x1c0   : > { %v1508_v38 = vmul.f32 %v1490_v30, %v2557_v34  ;;  %v1143_v35 = vadd.f32 %v1142_v24, %v1141_v43 }
 0x1c1   : > { %v1153_v7 = vadd.f32 %v1152_v41, %v1151_v45  ;;  %v1411_v46 = vadd.f32 %v1410_v44, %v1409_v18  ;;  %v1406_v58 = vadd.f32 %v1405_v50, %v1404_v19  ;;  %v1258_v44 = vmul.f32 %v2859_v8, %v1215_v4 }
 0x1c2   : > { %v1123_v12 = vpop.f32.mrf.mxu2  ;;  %v1520_v1 = vadd.f32 %v1508_v38, %v1507_v52  ;;  %v1398_v38 = vrot.slane %v1397_v17, 1 }
 0x1c3   : > { %v1154_v62 = vrot.slane %v1153_v7, 2  ;;  %v1135_v23 = vmul.f32 %v1123_v12, %v2862_v9  ;;  %v1412_v56 = vrot.slane %v1411_v46, 1 }
 0x1c4   : > { %v1521_v63 = vrot.slane %v1520_v1, 4 }
 0x1c5   : > { %v2896_v47 = vpop.f32.mrf.mxu3  ;;  %v1155_v9 = vadd.f32 %v1154_v62, %v1153_v7  ;;  %v1413_v10 = vadd.f32 %v1412_v56, %v1411_v46  ;;  %v1399_v7 = vadd.f32 %v1398_v38, %v1397_v17 }
 0x1c6   : > { %v1522_v48 = vadd.f32 %v1521_v63, %v1520_v1  ;;  %v1382_v26 = vpop.f32.mrf.mxu0  ;;  %v1214_v63 = vadd.f32 %v1212_v32, %v1205_v16 }
 0x1c7   : > { %v1392_v15 = vmul.f32 %v1382_v26, %v2849_v54  ;;  %v1493_v61 = vpop.f32.mrf.mxu1  ;;  %v1156_v28 = vrot.slane %v1155_v9, 1  ;;  %v1260_v26 = vmul.f32 %v2896_v47, %v1215_v4 }
 0x1c8   : > { %v1523_v2 = vrot.slane %v1522_v48, 2  ;;  %v1509_v1 = vmul.f32 %v1493_v61, %v2554_v33  ;;  %v1259_v61 = vmul.f32 %v2885_v49, %v1214_v63  ;;  %v1257_v8 = vmul.f32 %v2823_v14, %v1214_v63 }
 0x1c9   : > { %v1414_v27 = vadd.f32 %v1392_v15, %v1391_v25  ;;  %v1425_v25 = vsel %vm530_vm2, %v1406_v58, %v1399_v7  ;;  %v1157_v15 = vadd.f32 %v1156_v28, %v1155_v9 }
 0x1ca   : > { %v1126_v54 = vpop.f32.mrf.mxu2  ;;  %v1524_v37 = vadd.f32 %v1523_v2, %v1522_v48  ;;  %v1150_v48 = vadd.f32 %v1149_v29, %v1148_v51  ;;  %v1426_v39 = vsel %vm532_vm4, %v1413_v10, %v1425_v25  ;;  %v1272_v46 = vadd.f32 %v1260_v26, %v1259_v61 }
 0x1cb   : > { %v1136_v22 = vmul.f32 %v1126_v54, %v2855_v3  ;;  %v1415_v45 = vrot.slane %v1414_v27, 4  ;;  %v1519_v3 = vadd.f32 %v1518_v59, %v1517_v0  ;;  %v1265_v17 = vadd.f32 %v1258_v44, %v1257_v8  ;;  %v1551_v8 = vld [vmem:[#allocation2] sm:$0xff] }
 0x1cc   : > { %v1525_v57 = vrot.slane %v1524_v37, 1  ;;  %v1169_v54 = vsel %vm530_vm2, %v1150_v48, %v1143_v35 }
 0x1cd   : > { %v1158_v40 = vadd.f32 %v1136_v22, %v1135_v23  ;;  %v1416_v55 = vadd.f32 %v1415_v45, %v1414_v27  ;;  %v1245_v30 = vpop.f32.mrf.mxu3  ;;  %v1170_v49 = vsel %vm532_vm4, %v1157_v15, %v1169_v54  ;;  %v1273_v45 = vrot.slane %v1272_v46, 4 }
 0x1ce   : > { %v1526_v21 = vadd.f32 %v1525_v57, %v1524_v37  ;;  %v1261_v27 = vmul.f32 %v1245_v30, %v1214_v63  ;;  %v1266_v57 = vrot.slane %v1265_v17, 4 }
 0x1cf   : > { %v1159_v52 = vrot.slane %v1158_v40, 4  ;;  %v1417_v41 = vrot.slane %v1416_v55, 2  ;;  %v1496_v12 = vpop.f32.mrf.mxu1  ;;  %v1274_v13 = vadd.f32 %v1273_v45, %v1272_v46 }
 0x1d0   : > { %v1545_v53 = vsel %vm530_vm2, %v1526_v21, %v1519_v3  ;;  %v1510_v20 = vmul.f32 %v1496_v12, %v2557_v34  ;;  %v1267_v56 = vadd.f32 %v1266_v57, %v1265_v17 }
 0x1d1   : > { %v1160_v18 = vadd.f32 %v1159_v52, %v1158_v40  ;;  %v1418_v6 = vadd.f32 %v1417_v41, %v1416_v55  ;;  %v1275_v52 = vrot.slane %v1274_v13, 2 }
 0x1d2   : > { %v1527_v0 = vadd.f32 %v1510_v20, %v1509_v1  ;;  %v1268_v41 = vrot.slane %v1267_v56, 2 }
 0x1d3   : > { %v1161_v31 = vrot.slane %v1160_v18, 2  ;;  %v1419_v5 = vrot.slane %v1418_v6, 1  ;;  %v1276_v20 = vadd.f32 %v1275_v52, %v1274_v13 }
 0x1d4   : > { %v1528_v60 = vrot.slane %v1527_v0, 4 }
 0x1d5   : > { %v1162_v36 = vadd.f32 %v1161_v31, %v1160_v18  ;;  %v1420_v11 = vadd.f32 %v1419_v5, %v1418_v6  ;;  %v1248_v16 = vpop.f32.mrf.mxu3  ;;  %v1277_v31 = vrot.slane %v1276_v20, 1 }
 0x1d6   : > { %v1529_v19 = vadd.f32 %v1528_v60, %v1527_v0  ;;  %v1262_v59 = vmul.f32 %v1248_v16, %v1215_v4 }
 0x1d7   : > { %v1163_v2 = vrot.slane %v1162_v36, 1  ;;  %v1427_v62 = vsel %vm534_vm8, %v1420_v11, %v1426_v39  ;;  %v1499_v47 = vpop.f32.mrf.mxu1  ;;  %v1278_v48 = vadd.f32 %v1277_v31, %v1276_v20 }
 0x1d8   : > { %1429 = vst [vmem:[#allocation2 + $0x1c] sm:$0xf] %v1427_v62  ;;  %v1530_v37 = vrot.slane %v1529_v19, 2  ;;  %v1279_v22 = vadd.f32 %v1262_v59, %v1261_v27  ;;  %v1511_v55 = vmul.f32 %v1499_v47, %v2554_v33  ;;  %v1550_v59 = vld [vmem:[%s2999_s4] sm:$0xff] }
 0x1d9   : > { %v1164_v23 = vadd.f32 %v1163_v2, %v1162_v36 }
 0x1da   : > { %v1531_v51 = vadd.f32 %v1530_v37, %v1529_v19  ;;  %v1280_v32 = vrot.slane %v1279_v22, 4  ;;  %v1552_v19 = vld [vmem:[#allocation2 + $0x8] sm:$0xff] }
 0x1db   : > { %v1171_v43 = vsel %vm534_vm8, %v1164_v23, %v1170_v49 }
 0x1dc   : > { %1173 = vst [vmem:[#allocation2 + $0x14] sm:$0xf] %v1171_v43  ;;  %v1532_v14 = vrot.slane %v1531_v51, 1  ;;  %v1281_v3 = vadd.f32 %v1280_v32, %v1279_v22 }
 0x1dd   : > { %v1251_v42 = vpop.f32.mrf.mxu3 }
 0x1de   : > { %v1533_v40 = vadd.f32 %v1532_v14, %v1531_v51  ;;  %v1282_v24 = vrot.slane %v1281_v3, 2  ;;  %v1263_v12 = vmul.f32 %v1251_v42, %v1214_v63 }
 0x1df   : > { %v1502_v50 = vpop.f32.mrf.mxu1 }
 0x1e0   : > { %v1546_v9 = vsel %vm532_vm4, %v1533_v40, %v1545_v53  ;;  %v1512_v30 = vmul.f32 %v1502_v50, %v2557_v34  ;;  %v1283_v6 = vadd.f32 %v1282_v24, %v1281_v3  ;;  %v1269_v53 = vadd.f32 %v1268_v41, %v1267_v56 }
 0x1e2   : > { %v1534_v21 = vadd.f32 %v1512_v30, %v1511_v55  ;;  %v1284_v7 = vrot.slane %v1283_v6, 1  ;;  %v1270_v35 = vrot.slane %v1269_v53, 1 }
 0x1e3   : > { %v1553_v2 = vld [vmem:[#allocation2 + $0x10] sm:$0xff] }
 0x1e4   : > { %v1535_v38 = vrot.slane %v1534_v21, 4  ;;  %v1285_v36 = vadd.f32 %v1284_v7, %v1283_v6 }
 0x1e5   : > { %v1254_v29 = vpop.f32.mrf.mxu3 }
 0x1e6   : > { %v1536_v18 = vadd.f32 %v1535_v38, %v1534_v21  ;;  %v1264_v1 = vmul.f32 %v1254_v29, %v1215_v4  ;;  %v1271_v4 = vadd.f32 %v1270_v35, %v1269_v53 }
 0x1e8   : > { %v1537_v58 = vrot.slane %v1536_v18, 2  ;;  %v1286_v28 = vadd.f32 %v1264_v1, %v1263_v12  ;;  %v1297_v25 = vsel %vm530_vm2, %v1278_v48, %v1271_v4 }
 0x1e9   : > { %v1298_v61 = vsel %vm532_vm4, %v1285_v36, %v1297_v25 }
 0x1ea   : > { %v1538_v10 = vadd.f32 %v1537_v58, %v1536_v18  ;;  %v1287_v33 = vrot.slane %v1286_v28, 4 }
 0x1ec   : > { %v1539_v34 = vrot.slane %v1538_v10, 1  ;;  %v1288_v0 = vadd.f32 %v1287_v33, %v1286_v28 }
 0x1ee   : > { %v1540_v44 = vadd.f32 %v1539_v34, %v1538_v10  ;;  %v1289_v5 = vrot.slane %v1288_v0, 2 }
 0x1f0   : > { %v1547_v26 = vsel %vm534_vm8, %v1540_v44, %v1546_v9  ;;  %v1290_v63 = vadd.f32 %v1289_v5, %v1288_v0 }
 0x1f1   : > { %1549 = vst [vmem:[#allocation2 + $0x20] sm:$0xf] %v1547_v26 }
 0x1f2   : > { %v1291_v60 = vrot.slane %v1290_v63, 1 }
 0x1f4   : > { %v1292_v15 = vadd.f32 %v1291_v60, %v1290_v63 }
 0x1f6   : > { %v1299_v11 = vsel %vm534_vm8, %v1292_v15, %v1298_v61 }
 0x1f7   : > { %1301 = vst [vmem:[#allocation2 + $0x18] sm:$0xf] %v1299_v11 }
 0x1f8   : > { %v1555_v16 = vld [vmem:[#allocation2 + $0x20] sm:$0xf] }
 0x1f9   : > { %1791 = vmatpush.msk.msra.mxu2 %vm356_vm0, %v1555_v16 }
 0x1fe   : > { %v1554_v39 = vld [vmem:[#allocation2 + $0x18] sm:$0xff] }
 0x1ff   : > { %1574 = vmatpush.msra.mxu2 %v1554_v39 }
 0x201   : > { %1575 = vmatpush.msra.mxu2 %v1553_v2 }
 0x203   : > { %1576 = vmatpush.msra.mxu2 %v1552_v19 }
 0x205   : > { %1577 = vmatpush.msra.mxu2 %v1551_v8 }
 0x206   : > { %1792 = vmatmul.msk.f32.vlgmr.msra.gmra.mxu2 %vm346_vm1, %v1550_v59 }
 0x289   : > { %v1579_v62 = vpop.f32.mrf.mxu2 }
 0x28a   : > { %1582 = vst [vmem:[%s319_s16] sm:$0xff] %v1579_v62 }
 0x28b   : > { %1932 = shalt.err (!%p1929_p11)
}
 0x28c   : > { %1834 = dma.vmem_to_hbm [thread:$0]  (%p2091_p8), %s1599_s17, 128, %s1601_s0, %s1584_s26  }
 0x28d PF: > { %p1840_p12 = scmp.ge.s32.totalorder %s1999_s25, 2  ;;  %s1612_s6 = sand.u32 1, %s1971_s18  }
 0x28e   : > { %s1613_s11 = scalar_lea.sflag [#allocation5], %s1612_s6 }
 0x28f   : > { %p1837_p13 = pnand %p1840_p12, %p2095_p9 }
 0x291   : > { %p1838_p0 = pneg %p1837_p13 }
 0x293   : > { %1966 = dma.done.wait (%p1838_p0), %s1613_s11, 128  }
 0x294   : > { %1968 = vsyncadd (%p1838_p0), %s1613_s11, 4294967168  ;;  %s18_s25 = sadd.s32 1, %s1999_s25   ;;  %s3074_s18 = smov %s1975_s19 }
 0x295   : > { %p15_p1 = scmp.ge.s32.totalorder %s18_s25, 6   ;;  %s3075_s19 = smov %s1979_s20 }
 0x296   : > { %s3076_s20 = smov %s2103_s12  ;;  %s3077_s21 = smov %s1991_s23 }
 0x297   : > { %s3078_s22 = smov %s1995_s24  ;;  %s3079_s23 = smov %s3082_s28 }
 0x298   : > { %s3080_s24 = smov %s3086_s29  ;;  %17 = sbr.rel (!%p15_p1) target bundleno = 8 (0x8), region = 124 }
 0x29d   :  { %1619 = vsyncpa [#allocation5], 1 }
 0x29e   :  { %1621 = vsyncpa [#allocation5 + $0x1], 1 }

</bundles_post_ra>
